<compile_context>
chip_gen: v7x
topology: tpu7x:2x2x1
jax: 0.10.0
libtpu: 0.0.40
codegen_flags: <defaults>
</compile_context>

<pallas_src>
import jax
import jax.numpy as jnp
from jax import lax
from jax.experimental import pallas as pl
from jax.experimental.pallas import tpu as pltpu
import numpy as np

EPS = 1e-5


def _build_toeplitz_weights(w_hwio, W):
    """(3,3,Cin,Cout) conv kernel -> (3*W*Cin, W*Cout) block-banded matmul weights.

    Wbig[kh*W*Cin + w'*Cin + cin, w*Cout + cout] = K[kh, w'-w+1, cin, cout]
    (zero outside the 3-wide band).  Zero padding along W is implicit (out-of-range
    taps have no row); zero padding along H is handled in-kernel by masking the
    rolled rows.
    """
    C_in, C_out = w_hwio.shape[2], w_hwio.shape[3]
    kw = jnp.arange(W)[:, None] - jnp.arange(W)[None, :] + 1          # (W', W)
    valid = ((kw >= 0) & (kw <= 2)).astype(w_hwio.dtype)
    blk = w_hwio[:, jnp.clip(kw, 0, 2)]                               # (3, W', W, Cin, Cout)
    blk = blk * valid[None, :, :, None, None]
    blk = jnp.transpose(blk, (0, 1, 3, 2, 4))                         # (3, W', Cin, W, Cout)
    return blk.reshape(3 * W * C_in, W * C_out)


def _residual_block_kernel(x_ref, w1_ref, w2_ref, b1_ref, b2_ref, o_ref):
    # x_ref : (Bblk, H, W*C) f32   lane-dense activation slab (batch folded into M)
    # w*_ref: (3*W*C, W*C) bf16    block-banded conv weights (BN scale folded in)
    # b*_ref: (1, W*C) f32         BN shift, tiled over W
    # o_ref : (Bblk, H, W*C) f32
    Bblk, H, WC = x_ref.shape
    M = Bblk * H
    x = x_ref[...].reshape(M, WC)                                 # (M, W*C) f32

    # Hoisted border masks, shared by both convs.  row % H keeps the sublane rolls
    # from leaking rows across the images folded into M.
    hrow = lax.broadcasted_iota(jnp.int32, (M, WC), 0) % H
    has_up = hrow > 0                                             # row h-1 exists
    has_dn = hrow < (H - 1)                                       # row h+1 exists

    def conv_bn(z, w_ref, b_ref):
        # z: (M, W*C) f32.  Rows h-1 / h+1 via XLU sublane rotations (non-negative
        # shifts only), zero-masked at image borders; operands assembled in bf16.
        zb = z.astype(jnp.bfloat16)
        up = jnp.where(has_up,
                       pltpu.roll(z, shift=1, axis=0).astype(jnp.bfloat16), 0.0)
        dn = jnp.where(has_dn,
                       pltpu.roll(z, shift=M - 1, axis=0).astype(jnp.bfloat16), 0.0)
        z3 = jnp.concatenate([up, zb, dn], axis=-1)               # (M, 3*W*C) bf16
        acc = jnp.dot(z3, w_ref[...], preferred_element_type=jnp.float32)
        return acc + b_ref[...]                                   # (M, W*C) f32

    y1 = jnp.maximum(conv_bn(x, w1_ref, b1_ref), 0.0)             # conv1 + BN1 + ReLU
    y2 = conv_bn(y1, w2_ref, b2_ref)                              # conv2 + BN2
    out = jnp.maximum(y2 + x, 0.0)                                # residual + ReLU (f32)
    o_ref[...] = out.reshape(Bblk, H, WC).astype(o_ref.dtype)


def _pick_batch_block(B, H, target_m=256):
    """Largest divisor of B with Bblk*H <= target_m, keeping >=2 grid steps (v7x)."""
    best = 1
    for d in range(1, B + 1):
        if B % d == 0 and d * H <= target_m and (B < 2 or B // d >= 2):
            best = d
    return best


def residual_block_pallas(x_nchw, w1_oihw, w2_oihw,
                          g1, be1, m1, v1, g2, be2, m2, v2):
    """x_nchw: (B, C, H, W) float32 (PyTorch layout). Returns (B, C, H, W)."""
    B, C, H, W = x_nchw.shape
    WC = W * C
    Bblk = _pick_batch_block(B, H)

    # NCHW -> NHWC -> lane-dense (B, H, W*C) slab (single boundary transpose).
    x = jnp.transpose(x_nchw, (0, 2, 3, 1)).astype(jnp.float32).reshape(B, H, WC)

    # Fold eval-mode BN: scale into conv weights, shift as per-lane bias row.
    inv1 = g1 / jnp.sqrt(v1 + EPS)
    inv2 = g2 / jnp.sqrt(v2 + EPS)
    sh1 = be1 - m1 * inv1
    sh2 = be2 - m2 * inv2

    # OIHW -> HWIO, scale output channels, build block-banded matmul weights (bf16).
    w1 = jnp.transpose(w1_oihw, (2, 3, 1, 0)).astype(jnp.float32) * inv1[None, None, None, :]
    w2 = jnp.transpose(w2_oihw, (2, 3, 1, 0)).astype(jnp.float32) * inv2[None, None, None, :]
    w1big = _build_toeplitz_weights(w1, W).astype(jnp.bfloat16)   # (3*W*C, W*C)
    w2big = _build_toeplitz_weights(w2, W).astype(jnp.bfloat16)

    b1 = jnp.tile(sh1, W).reshape(1, WC).astype(jnp.float32)
    b2 = jnp.tile(sh2, W).reshape(1, WC).astype(jnp.float32)

    flops = 2 * 2 * B * H * (3 * WC) * WC                         # 2 convs, 2*M*K*N each
    bytes_accessed = (2 * B * H * WC * 4          # x in + out (f32)
                      + 2 * (3 * WC * WC * 2)     # two bf16 weight matrices
                      + 2 * WC * 4)               # bias rows

    out = pl.pallas_call(
        _residual_block_kernel,
        out_shape=jax.ShapeDtypeStruct((B, H, WC), jnp.float32),
        grid_spec=pltpu.PrefetchScalarGridSpec(
            num_scalar_prefetch=0,
            grid=(B // Bblk,),
            in_specs=[
                pl.BlockSpec((Bblk, H, WC), lambda b: (b, 0, 0)),
                # Grid-invariant operands: single-buffered (nothing to pipeline).
                pl.BlockSpec((3 * WC, WC), lambda b: (0, 0),
                             pipeline_mode=pl.Buffered(1)),
                pl.BlockSpec((3 * WC, WC), lambda b: (0, 0),
                             pipeline_mode=pl.Buffered(1)),
                pl.BlockSpec((1, WC), lambda b: (0, 0),
                             pipeline_mode=pl.Buffered(1)),
                pl.BlockSpec((1, WC), lambda b: (0, 0),
                             pipeline_mode=pl.Buffered(1)),
            ],
            out_specs=pl.BlockSpec((Bblk, H, WC), lambda b: (b, 0, 0)),
        ),
        compiler_params=pltpu.CompilerParams(
            dimension_semantics=("parallel",)),
        cost_estimate=pl.CostEstimate(flops=flops, transcendentals=0,
                                      bytes_accessed=bytes_accessed),
    )(x, w1big, w2big, b1, b2)

    out = out.reshape(B, H, W, C)
    return jnp.transpose(out, (0, 3, 1, 2))


def reference_forward(x, w1, w2, g1, be1, m1, v1, g2, be2, m2, v2):
    """Pure-JAX f32 reference of the PyTorch forward (NCHW)."""
    def conv(z, w):
        return lax.conv_general_dilated(
            z, w, (1, 1), [(1, 1), (1, 1)],
            dimension_numbers=("NCHW", "OIHW", "NCHW"),
            precision=lax.Precision.HIGHEST)

    def bn(z, g, b, m, v):
        inv = g / jnp.sqrt(v + EPS)
        return z * inv[None, :, None, None] + (b - m * inv)[None, :, None, None]

    y = jnp.maximum(bn(conv(x, w1), g1, be1, m1, v1), 0.0)
    y = bn(conv(y, w2), g2, be2, m2, v2)
    return jnp.maximum(y + x, 0.0)


if __name__ == "__main__":
    B, C, H, W = 8, 16, 16, 16          # channel_size=16, stride=1
    key = jax.random.PRNGKey(0)
    ks = jax.random.split(key, 10)

    x = jax.random.normal(ks[0], (B, C, H, W), jnp.float32)
    w1 = jax.random.normal(ks[1], (C, C, 3, 3), jnp.float32) * 0.1   # OIHW
    w2 = jax.random.normal(ks[2], (C, C, 3, 3), jnp.float32) * 0.1
    g1 = jax.random.uniform(ks[3], (C,), jnp.float32, 0.5, 1.5)
    be1 = jax.random.normal(ks[4], (C,), jnp.float32) * 0.1
    m1 = jax.random.normal(ks[5], (C,), jnp.float32) * 0.1
    v1 = jax.random.uniform(ks[6], (C,), jnp.float32, 0.5, 1.5)
    g2 = jax.random.uniform(ks[7], (C,), jnp.float32, 0.5, 1.5)
    be2 = jax.random.normal(ks[8], (C,), jnp.float32) * 0.1
    m2 = jax.random.normal(ks[9], (C,), jnp.float32) * 0.1
    v2 = jnp.ones((C,), jnp.float32) * 0.9

    fn = jax.jit(residual_block_pallas)
    out = fn(x, w1, w2, g1, be1, m1, v1, g2, be2, m2, v2)
    out = jax.block_until_ready(out)

    ref = reference_forward(x, w1, w2, g1, be1, m1, v1, g2, be2, m2, v2)
    # Relaxed tolerance: the conv matmuls run on the bf16 MXU path (f32 accumulation);
    # a wrong tap/mask would produce errors of O(0.5-2), far above this threshold.
    np.testing.assert_allclose(np.asarray(out), np.asarray(ref),
                               rtol=5e-2, atol=5e-2)
    print("KERNEL_OK")
</pallas_src>

<mosaic_0001>
module attributes {stable_mosaic.version = 11 : i64} {
  func.func @_residual_block_kernel(%arg0: i32, %arg1: memref<4x16x256xf32, #tpu.memory_space<vmem>>, %arg2: memref<768x256xbf16, #tpu.memory_space<vmem>>, %arg3: memref<768x256xbf16, #tpu.memory_space<vmem>>, %arg4: memref<1x256xf32, #tpu.memory_space<vmem>>, %arg5: memref<1x256xf32, #tpu.memory_space<vmem>>, %arg6: memref<4x16x256xf32, #tpu.memory_space<vmem>>) attributes {dimension_semantics = [#tpu.dimension_semantics<parallel>], iteration_bounds = array<i64: 2>, scalar_prefetch = 0 : i64, scratch_operands = 0 : i64, tpu.core_type = #tpu.core_type<tc>, window_params = [{transform_indices = @transform_0, window_bounds = array<i64: 4, 16, 256>}, {pipeline_mode = #tpu.pipeline_mode<synchronous>, transform_indices = @transform_1, window_bounds = array<i64: 768, 256>}, {pipeline_mode = #tpu.pipeline_mode<synchronous>, transform_indices = @transform_2, window_bounds = array<i64: 768, 256>}, {pipeline_mode = #tpu.pipeline_mode<synchronous>, transform_indices = @transform_3, window_bounds = array<i64: 1, 256>}, {pipeline_mode = #tpu.pipeline_mode<synchronous>, transform_indices = @transform_4, window_bounds = array<i64: 1, 256>}, {transform_indices = @transform_5, window_bounds = array<i64: 4, 16, 256>}]} {
    %c0 = arith.constant 0 : index
    %c0_0 = arith.constant 0 : index
    %c0_1 = arith.constant 0 : index
    %0 = vector.load %arg1[%c0, %c0_0, %c0_1] : memref<4x16x256xf32, #tpu.memory_space<vmem>>, vector<4x16x256xf32>
    %1 = vector.shape_cast %0 : vector<4x16x256xf32> to vector<64x256xf32>
    %2 = tpu.iota {dimensions = array<i32: 0>} : vector<64x256xi32>
    %c16_i32 = arith.constant 16 : i32
    %c0_i32 = arith.constant 0 : i32
    %3 = arith.cmpi eq, %c16_i32, %c0_i32 : i32
    %c1_i32 = arith.constant 1 : i32
    %4 = arith.select %3, %c1_i32, %c16_i32 : i32
    %5 = vector.broadcast %4 : i32 to vector<64x256xi32>
    %6 = arith.remsi %2, %5 : vector<64x256xi32>
    %c0_i32_2 = arith.constant 0 : i32
    %7 = vector.broadcast %c0_i32_2 : i32 to vector<64x256xi32>
    %8 = arith.cmpi ne, %6, %7 : vector<64x256xi32>
    %c0_i32_3 = arith.constant 0 : i32
    %9 = vector.broadcast %c0_i32_3 : i32 to vector<64x256xi32>
    %10 = arith.cmpi slt, %6, %9 : vector<64x256xi32>
    %c0_i32_4 = arith.constant 0 : i32
    %11 = arith.cmpi slt, %4, %c0_i32_4 : i32
    %12 = vector.broadcast %11 : i1 to vector<64x256xi1>
    %13 = vector.broadcast %12 : vector<64x256xi1> to vector<64x256xi1>
    %14 = arith.xori %10, %13 : vector<64x256xi1>
    %15 = arith.andi %14, %8 : vector<64x256xi1>
    %16 = vector.broadcast %4 : i32 to vector<64x256xi32>
    %17 = arith.addi %6, %16 : vector<64x256xi32>
    %18 = arith.select %15, %17, %6 : vector<64x256xi1>, vector<64x256xi32>
    %c0_i32_5 = arith.constant 0 : i32
    %19 = vector.broadcast %c0_i32_5 : i32 to vector<64x256xi32>
    %20 = arith.cmpi sgt, %18, %19 : vector<64x256xi32>
    %c15_i32 = arith.constant 15 : i32
    %21 = vector.broadcast %c15_i32 : i32 to vector<64x256xi32>
    %22 = arith.cmpi slt, %18, %21 : vector<64x256xi32>
    %23 = arith.truncf %1 : vector<64x256xf32> to vector<64x256xbf16>
    %c1_i32_6 = arith.constant 1 : i32
    %24 = tpu.dynamic_rotate %1 by %c1_i32_6 dim 0 : vector<64x256xf32>, i32 -> vector<64x256xf32>
    %25 = arith.truncf %24 : vector<64x256xf32> to vector<64x256xbf16>
    %cst = arith.constant 0.000000e+00 : f32
    %26 = arith.truncf %cst : f32 to bf16
    %27 = vector.broadcast %26 : bf16 to vector<64x256xbf16>
    %28 = arith.select %20, %25, %27 : vector<64x256xi1>, vector<64x256xbf16>
    %c63_i32 = arith.constant 63 : i32
    %29 = tpu.dynamic_rotate %1 by %c63_i32 dim 0 : vector<64x256xf32>, i32 -> vector<64x256xf32>
    %30 = arith.truncf %29 : vector<64x256xf32> to vector<64x256xbf16>
    %cst_7 = arith.constant 0.000000e+00 : f32
    %31 = arith.truncf %cst_7 : f32 to bf16
    %32 = vector.broadcast %31 : bf16 to vector<64x256xbf16>
    %33 = arith.select %22, %30, %32 : vector<64x256xi1>, vector<64x256xbf16>
    %34 = tpu.concatenate %28, %23, %33 in 1 : vector<64x256xbf16>, vector<64x256xbf16>, vector<64x256xbf16> -> vector<64x768xbf16>
    %c0_8 = arith.constant 0 : index
    %c0_9 = arith.constant 0 : index
    %35 = vector.load %arg2[%c0_8, %c0_9] : memref<768x256xbf16, #tpu.memory_space<vmem>>, vector<768x256xbf16>
    %cst_10 = arith.constant dense<0.000000e+00> : vector<64x256xf32>
    %36 = tpu.matmul %34, %35, %cst_10 {dimension_numbers = #tpu.dot_dimension_numbers<[1], [0], [0], [1], [0, 0, 1, 1], [], []>} : vector<64x768xbf16>, vector<768x256xbf16>, vector<64x256xf32> -> vector<64x256xf32>
    %c0_11 = arith.constant 0 : index
    %c0_12 = arith.constant 0 : index
    %37 = vector.load %arg4[%c0_11, %c0_12] : memref<1x256xf32, #tpu.memory_space<vmem>>, vector<1x256xf32>
    %38 = vector.broadcast %37 : vector<1x256xf32> to vector<64x256xf32>
    %39 = arith.addf %36, %38 : vector<64x256xf32>
    %cst_13 = arith.constant 0.000000e+00 : f32
    %40 = vector.broadcast %cst_13 : f32 to vector<64x256xf32>
    %41 = arith.maximumf %39, %40 : vector<64x256xf32>
    %42 = arith.truncf %41 : vector<64x256xf32> to vector<64x256xbf16>
    %c1_i32_14 = arith.constant 1 : i32
    %43 = tpu.dynamic_rotate %41 by %c1_i32_14 dim 0 : vector<64x256xf32>, i32 -> vector<64x256xf32>
    %44 = arith.truncf %43 : vector<64x256xf32> to vector<64x256xbf16>
    %cst_15 = arith.constant 0.000000e+00 : f32
    %45 = arith.truncf %cst_15 : f32 to bf16
    %46 = vector.broadcast %45 : bf16 to vector<64x256xbf16>
    %47 = arith.select %20, %44, %46 : vector<64x256xi1>, vector<64x256xbf16>
    %c63_i32_16 = arith.constant 63 : i32
    %48 = tpu.dynamic_rotate %41 by %c63_i32_16 dim 0 : vector<64x256xf32>, i32 -> vector<64x256xf32>
    %49 = arith.truncf %48 : vector<64x256xf32> to vector<64x256xbf16>
    %cst_17 = arith.constant 0.000000e+00 : f32
    %50 = arith.truncf %cst_17 : f32 to bf16
    %51 = vector.broadcast %50 : bf16 to vector<64x256xbf16>
    %52 = arith.select %22, %49, %51 : vector<64x256xi1>, vector<64x256xbf16>
    %53 = tpu.concatenate %47, %42, %52 in 1 : vector<64x256xbf16>, vector<64x256xbf16>, vector<64x256xbf16> -> vector<64x768xbf16>
    %c0_18 = arith.constant 0 : index
    %c0_19 = arith.constant 0 : index
    %54 = vector.load %arg3[%c0_18, %c0_19] : memref<768x256xbf16, #tpu.memory_space<vmem>>, vector<768x256xbf16>
    %cst_20 = arith.constant dense<0.000000e+00> : vector<64x256xf32>
    %55 = tpu.matmul %53, %54, %cst_20 {dimension_numbers = #tpu.dot_dimension_numbers<[1], [0], [0], [1], [0, 0, 1, 1], [], []>} : vector<64x768xbf16>, vector<768x256xbf16>, vector<64x256xf32> -> vector<64x256xf32>
    %c0_21 = arith.constant 0 : index
    %c0_22 = arith.constant 0 : index
    %56 = vector.load %arg5[%c0_21, %c0_22] : memref<1x256xf32, #tpu.memory_space<vmem>>, vector<1x256xf32>
    %57 = vector.broadcast %56 : vector<1x256xf32> to vector<64x256xf32>
    %58 = arith.addf %55, %57 : vector<64x256xf32>
    %59 = arith.addf %58, %1 : vector<64x256xf32>
    %cst_23 = arith.constant 0.000000e+00 : f32
    %60 = vector.broadcast %cst_23 : f32 to vector<64x256xf32>
    %61 = arith.maximumf %59, %60 : vector<64x256xf32>
    %62 = vector.shape_cast %61 : vector<64x256xf32> to vector<4x16x256xf32>
    %c0_24 = arith.constant 0 : index
    %c0_25 = arith.constant 0 : index
    %c0_26 = arith.constant 0 : index
    %63 = vector.load %arg6[%c0_24, %c0_25, %c0_26] : memref<4x16x256xf32, #tpu.memory_space<vmem>>, vector<4x16x256xf32>
    tpu.vector_store %arg6[%c0_24, %c0_25, %c0_26], %62 {strides = array<i32>} : memref<4x16x256xf32, #tpu.memory_space<vmem>>, vector<4x16x256xf32>,
    return
  }
  func.func @transform_0(%arg0: i32) -> (i32, i32, i32) {
    %c0_i32 = arith.constant 0 : i32
    %c0_i32_0 = arith.constant 0 : i32
    %c0_i32_1 = arith.constant 0 : i32
    return %arg0, %c0_i32, %c0_i32_0 : i32, i32, i32
  }
  func.func @transform_1(%arg0: i32) -> (i32, i32) {
    %c0_i32 = arith.constant 0 : i32
    %c0_i32_0 = arith.constant 0 : i32
    %c0_i32_1 = arith.constant 0 : i32
    return %c0_i32, %c0_i32_0 : i32, i32
  }
  func.func @transform_2(%arg0: i32) -> (i32, i32) {
    %c0_i32 = arith.constant 0 : i32
    %c0_i32_0 = arith.constant 0 : i32
    %c0_i32_1 = arith.constant 0 : i32
    return %c0_i32, %c0_i32_0 : i32, i32
  }
  func.func @transform_3(%arg0: i32) -> (i32, i32) {
    %c0_i32 = arith.constant 0 : i32
    %c0_i32_0 = arith.constant 0 : i32
    %c0_i32_1 = arith.constant 0 : i32
    return %c0_i32, %c0_i32_0 : i32, i32
  }
  func.func @transform_4(%arg0: i32) -> (i32, i32) {
    %c0_i32 = arith.constant 0 : i32
    %c0_i32_0 = arith.constant 0 : i32
    %c0_i32_1 = arith.constant 0 : i32
    return %c0_i32, %c0_i32_0 : i32, i32
  }
  func.func @transform_5(%arg0: i32) -> (i32, i32, i32) {
    %c0_i32 = arith.constant 0 : i32
    %c0_i32_0 = arith.constant 0 : i32
    %c0_i32_1 = arith.constant 0 : i32
    return %arg0, %c0_i32, %c0_i32_0 : i32, i32, i32
  }
}

</mosaic_0001>

<bundles_post_ra>
// kernel: tile.13
= control target key start
LH: loop header
LB: loop body
LE: loop exit
PB: predicated region body
PF: predicated region fallthrough
CT: control target
= control target key end

     0   :  { %s28_s0 = inlined_call_operand.vmem [shape: f32[16], index: 0, kind: input, shape index: {}]   ;;  %s29_s1 = inlined_call_operand.vmem [shape: f32[16,16], index: 1, kind: output, shape index: {}]  }
   0x1   :  { %v4_v0 = vld [vmem:[%s28_s0] ss:$0 sm:$0xff] }
   0x2   :  { %5 = vst [vmem:[%s29_s1] sm:$0xff] %v4_v0  ;;  %8 = vst [vmem:[%s29_s1 + $0x8] sm:$0xff] %v4_v0 }

// kernel: tile.14
= control target key start
LH: loop header
LB: loop body
LE: loop exit
PB: predicated region body
PF: predicated region fallthrough
CT: control target
= control target key end

     0   :  { %s7_s6 = smov 3  ;;  %s21_s9 = smov 3  ;;  %vm4_vm0 = vcmask 130048   ;;  %vm11_vm1 = vcmask 1048448   ;;  %vm18_vm2 = vcmask 917248   ;;  %vm25_vm3 = vcmask 786048   ;;  %s128_s0 = inlined_call_operand.vmem [shape: f32[16,16], index: 0, kind: input, shape index: {}]   ;;  %s129_s1 = inlined_call_operand.vmem [shape: f32[1,256], index: 1, kind: output, shape index: {}]  }
   0x1   :  { %v66_v0 = vld [vmem:[%s128_s0 + $0x7] ss:$8 sm:%s7_s6]   ;;  %s81_s10 = smov 112   ;;  %v68_v1 = vld [vmem:[%s128_s0 + $0x5] ss:$8 sm:%s21_s9]   ;;  %s14_s13 = smov 3 }
   0x2   :  { %9 = vrot.lane.b32.xlu0 %v66_v0, %s81_s10  ;;  %s82_s14 = smov 80   ;;  %v67_v2 = vld [vmem:[%s128_s0 + $0x6] ss:$8 sm:%s14_s13]   ;;  %s28_s17 = smov 3  ;;  %vm32_vm4 = vcmask 654848   ;;  %vm39_vm5 = vcmask 523648  }
   0x3   :  { %23 = vrot.lane.b32.xlu1 %v68_v1, %s82_s14  ;;  %v69_v3 = vld [vmem:[%s128_s0 + $0x4] ss:$8 sm:%s28_s17]   ;;  %s35_s20 = smov 3  ;;  %s42_s21 = smov 3  ;;  %vm46_vm6 = vcmask 392448   ;;  %vm53_vm7 = vcmask 261248  }
   0x4   :  { %s83_s22 = smov 96   ;;  %s84_s23 = smov 64   ;;  %v70_v4 = vld [vmem:[%s128_s0 + $0x3] ss:$8 sm:%s35_s20]   ;;  %v71_v5 = vld [vmem:[%s128_s0 + $0x2] ss:$8 sm:%s42_s21]  }
   0x5   :  { %s2_s26 = smov 3  ;;  %s49_s29 = smov 3 }
   0x6   :  { %16 = vrot.lane.b32.xlu0 %v67_v2, %s83_s22  ;;  %v3_v6 = vld [vmem:[%s128_s0] ss:$8 sm:%s2_s26]   ;;  %s85_s3 = smov 48   ;;  %s86_s4 = smov 32  }
   0x7   :  { %30 = vrot.lane.b32.xlu1 %v69_v3, %s84_s23  ;;  %5 = vst.msk [vmem:[#allocation0] ss:$8 sm:$0x3] %vm4_vm0, %v3_v6   ;;  %v72_v7 = vld [vmem:[%s128_s0 + $0x1] ss:$8 sm:%s49_s29]   ;;  %s87_s0 = smov 16  }
   0xa   :  { %37 = vrot.lane.b32.xlu0 %v70_v4, %s85_s3 }
   0xb   :  { %44 = vrot.lane.b32.xlu1 %v71_v5, %s86_s4 }
   0xe   :  { %51 = vrot.lane.b32.xlu0 %v72_v7, %s87_s0 }
  0x74   :  { %v10_v8 = vpop.permute.xlu0 %9  }
  0x75   :  { %12 = vst.msk [vmem:[#allocation0] ss:$8 sm:$0x3] %vm11_vm1, %v10_v8   ;;  %v24_v9 = vpop.permute.xlu1 %23  }
  0x78   :  { %v17_v10 = vpop.permute.xlu0 %16  }
  0x79   :  { %19 = vst.msk [vmem:[#allocation0] ss:$8 sm:$0x3] %vm18_vm2, %v17_v10   ;;  %v31_v11 = vpop.permute.xlu1 %30  }
  0x7a   :  { %26 = vst.msk [vmem:[#allocation0] ss:$8 sm:$0x3] %vm25_vm3, %v24_v9  }
  0x7b   :  { %33 = vst.msk [vmem:[#allocation0] ss:$8 sm:$0x3] %vm32_vm4, %v31_v11  }
  0x7c   :  { %v38_v12 = vpop.permute.xlu0 %37  }
  0x7d   :  { %40 = vst.msk [vmem:[#allocation0] ss:$8 sm:$0x3] %vm39_vm5, %v38_v12   ;;  %v45_v13 = vpop.permute.xlu1 %44  }
  0x7e   :  { %47 = vst.msk [vmem:[#allocation0] ss:$8 sm:$0x3] %vm46_vm6, %v45_v13  }
  0x80   :  { %v52_v14 = vpop.permute.xlu0 %51  }
  0x81   :  { %54 = vst.msk [vmem:[#allocation0] ss:$8 sm:$0x3] %vm53_vm7, %v52_v14  }
  0x88   :  { %v58_v15 = vld [vmem:[#allocation0] sm:$0x1]  ;;  %v62_v16 = vld [vmem:[#allocation0 + $0x8] sm:$0x1] }
  0x89   :  { %60 = vst [vmem:[%s129_s1] sm:$0x1] %v58_v15  ;;  %73 = vst [vmem:[%s129_s1 + $0x1] sm:$0x1] %v62_v16 }

// kernel: residual_block_pallas.1
= control target key start
LH: loop header
LB: loop body
LE: loop exit
PB: predicated region body
PF: predicated region fallthrough
CT: control target
= control target key end

     0   :  { %s3080_s18 = smov 0   ;;  %s4440_s0 = inlined_call_operand.vmem [shape: f32[8,16,256], index: 0, kind: input, shape index: {}]   ;;  %s4441_s1 = inlined_call_operand.vmem [shape: bf16[768,256], index: 1, kind: input, shape index: {}]   ;;  %s4442_s2 = inlined_call_operand.vmem [shape: bf16[768,256], index: 2, kind: input, shape index: {}]   ;;  %s4443_s3 = inlined_call_operand.vmem [shape: f32[1,256], index: 3, kind: input, shape index: {}]   ;;  %s4444_s4 = inlined_call_operand.vmem [shape: f32[1,256], index: 4, kind: input, shape index: {}]   ;;  %s4445_s5 = inlined_call_operand.vmem [shape: f32[8,16,256], index: 5, kind: output, shape index: {}]  }
   0x1 LB: > { %s2383_s19 = sadd.s32 4294967295, %s3046_s18   ;;  %p2387_p0 = scmp.ge.s32.totalorder %s3046_s18, 1  ;;  %s3046_s18 = sphi %s3080_s18, %s15_s18  }
   0x2   : > { %p189_p1 = scmp.lt.s32.totalorder %s3046_s18, 3 }
   0x4   : > { %p190_p2 = pnand %p2387_p0, %p189_p1 }
   0x6   : > { %193 = sbr.rel (%p190_p2) target bundleno = 830 (0x33e), region = 40 }
   0xd   : > { %v2736_v0 = vld [vmem:[%s4441_s1 + $0x4] ss:$8 sps:$4 sm:$0xff]   ;;  %v2738_v1 = vld [vmem:[%s4441_s1] ss:$8 sps:$4 sm:$0xff]   ;;  %v2739_v2 = vld [vmem:[%s4441_s1 + $0x14] ss:$8 sps:$4 sm:$0xff]   ;;  %v252_v6 = vlaneseq }
   0xe   : > { %1131 = vmatprep.subr.bf16.mxu0 %v2736_v0  ;;  %v2741_v3 = vld [vmem:[%s4441_s1 + $0x10] ss:$8 sps:$4 sm:$0xff]   ;;  %v2742_v4 = vld [vmem:[%s4441_s1 + $0x24] ss:$8 sps:$4 sm:$0xff]   ;;  %s2388_s30 = sshll.u32 %s2383_s19, 2  ;;  %vm3048_vm3 = vmmov 1  }
   0xf   : > { %1132 = vmatpush1.bf16.msra.mxu0 %v2738_v1  ;;  %v2744_v5 = vld [vmem:[%s4441_s1 + $0x20] ss:$8 sps:$4 sm:$0xff]   ;;  %p220_p3 = scmp.lt.s32.totalorder %s2388_s30, 7  ;;  %v2745_v7 = vld [vmem:[%s4441_s1 + $0x34] ss:$8 sps:$4 sm:$0xff]   ;;  %v3114_v9 = vshrl.u32 %v252_v6, 7  ;;  %vm423_vm4 = vmpackc.low %vm3048_vm3, %vm3048_vm3 }
  0x10   : > { %1133 = vmatprep.subr.bf16.mxu0 %v2739_v2  ;;  %v2747_v8 = vld [vmem:[%s4441_s1 + $0x30] ss:$8 sps:$4 sm:$0xff]   ;;  %v2748_v10 = vld [vmem:[%s4441_s1 + $0x44] ss:$8 sps:$4 sm:$0xff]   ;;  %v2750_v11 = vld [vmem:[%s4441_s1 + $0x40] ss:$8 sps:$4 sm:$0xff]  }
  0x11   : > { %s4511_s30 = smov (!%p220_p3, %s2388_s30), 7  ;;  %v265_v12 = vand.u32 15, %v3114_v9  ;;  %v2751_v13 = vld [vmem:[%s4441_s1 + $0x54] ss:$8 sps:$4 sm:$0xff]   ;;  %v2753_v14 = vld [vmem:[%s4441_s1 + $0x50] ss:$8 sps:$4 sm:$0xff]  }
  0x12   : > { %s2628_s16 = sshll.u32 %s4511_s30, 5  ;;  %v2754_v16 = vld [vmem:[%s4441_s1 + $0x64] ss:$8 sps:$4 sm:$0xff]   ;;  %vm397_vm1 = vcmp.lt.s32.totalorder %v3114_v9, 1  ;;  %v2756_v22 = vld [vmem:[%s4441_s1 + $0x60] ss:$8 sps:$4 sm:$0xff]  }
  0x13   : > { %1134 = vmatpush1.bf16.msra.mxu0 %v2741_v3  ;;  %s3132_s22 = scalar_lea.vmem %s4440_s0, %s2628_s16  ;;  %vm3137_vm0 = vcmp.gt.s32.totalorder %v265_v12, 0  ;;  %v3049_v24 = vmov 0   ;;  %v2757_v26 = vld [vmem:[%s4441_s1 + $0x74] ss:$8 sps:$4 sm:$0xff]   ;;  %v2759_v32 = vld [vmem:[%s4441_s1 + $0x70] ss:$8 sps:$4 sm:$0xff]   ;;  %s4391_s10 = scalar_lea.vmem %s4445_s5, %s2628_s16 }
  0x14   : > { %1135 = vmatprep.subr.bf16.mxu0 %v2742_v4  ;;  %v3145_v17 = vld [vmem:[%s3132_s22 + $0x8] sm:$0xff]  ;;  %v3148_v18 = vld [vmem:[%s3132_s22 + $0x18] sm:$0xff]  ;;  %vm422_vm2 = vmpackc.low %vm3137_vm0, %vm3137_vm0  ;;  %v3172_v28 = vsel %vm423_vm4, 65537, %v3049_v24  ;;  %v255_v42 = vadd.s32 16, %v3114_v9  ;;  %v257_v52 = vadd.s32 32, %v3114_v9  ;;  %v259_v3 = vadd.s32 48, %v3114_v9 }
  0x15   : > { %v3152_v19 = vld [vmem:[%s3132_s22 + $0x78] sm:$0xff]  ;;  %v382_v20 = vrot.slane %v3145_v17, 7  ;;  %v384_v21 = vrot.slane %v3148_v18, 7  ;;  %v430_v25 = vsel %vm422_vm2, 65537, %v3049_v24  ;;  %v2760_v34 = vld [vmem:[%s4441_s1 + $0x84] ss:$8 sps:$4 sm:$0xff]  }
  0x16   : > { %v396_v23 = vrot.slane %v3152_v19, 7  ;;  %v2394_v30 = vcombine.low %v430_v25, %v3172_v28  ;;  %v2762_v35 = vld [vmem:[%s4441_s1 + $0x80] ss:$8 sps:$4 sm:$0xff]   ;;  %v2763_v36 = vld [vmem:[%s4441_s1 + $0x94] ss:$8 sps:$4 sm:$0xff]   ;;  %v279_v45 = vand.u32 15, %v255_v42 }
  0x17   : > { %1136 = vmatpush1.bf16.msra.mxu0 %v2744_v5  ;;  %v411_v27 = vsel %vm397_vm1, %v382_v20, %v384_v21  ;;  %v2765_v37 = vld [vmem:[%s4441_s1 + $0x90] ss:$8 sps:$4 sm:$0xff]   ;;  %v2766_v38 = vld [vmem:[%s4441_s1 + $0xa4] ss:$8 sps:$4 sm:$0xff]   ;;  %v2768_v39 = vld [vmem:[%s4441_s1 + $0xa0] ss:$8 sps:$4 sm:$0xff]  }
  0x18   : > { %1137 = vmatprep.subr.bf16.mxu0 %v2745_v7  ;;  %v413_v29 = vsel %vm397_vm1, %v396_v23, %v382_v20  ;;  %vm3182_vm5 = vcmp.ne.s16.totalorder %v2394_v30, 0  ;;  %v2769_v40 = vld [vmem:[%s4441_s1 + $0xb4] ss:$8 sps:$4 sm:$0xff]   ;;  %v2771_v41 = vld [vmem:[%s4441_s1 + $0xb0] ss:$8 sps:$4 sm:$0xff]   ;;  %v3229_v49 = vld [vmem:[%s3132_s22] sm:$0xff] }
  0x19   : > { %v415_v31 = vpack.c.bf16 %v411_v27, %v413_v29  ;;  %v2772_v43 = vld [vmem:[%s4441_s1 + $0xc4] ss:$8 sps:$4 sm:$0xff]   ;;  %v2774_v44 = vld [vmem:[%s4441_s1 + $0xc0] ss:$8 sps:$4 sm:$0xff]   ;;  %v2775_v46 = vld [vmem:[%s4441_s1 + $0xd4] ss:$8 sps:$4 sm:$0xff]  }
  0x1a   : > { %v2777_v47 = vld [vmem:[%s4441_s1 + $0xd0] ss:$8 sps:$4 sm:$0xff]   ;;  %v2778_v48 = vld [vmem:[%s4441_s1 + $0xe4] ss:$8 sps:$4 sm:$0xff]   ;;  %vm3234_vm6 = vcmp.gt.s32.totalorder %v279_v45, 0  ;;  %v381_v57 = vrot.slane %v3229_v49, 7 }
  0x1b   : > { %1138 = vmatpush1.bf16.msra.mxu0 %v2747_v8  ;;  %2498 = vmatprep.mubr.msk.bf16.mxu0 %vm3182_vm5, %v415_v31  ;;  %v3232_v50 = vld [vmem:[%s3132_s22 + $0x10] sm:$0xff]  ;;  %v3243_v54 = vld [vmem:[%s3132_s22 + $0x28] sm:$0xff]  ;;  %v3246_v55 = vld [vmem:[%s3132_s22 + $0x38] sm:$0xff]  ;;  %v293_v60 = vand.u32 15, %v257_v52  ;;  %v256_v29 = vadd.s32 24, %v3114_v9 }
  0x1c   : > { %1139 = vmatprep.subr.bf16.mxu0 %v2748_v10  ;;  %v3240_v53 = vld [vmem:[%s3132_s22 + $0x70] sm:$0xff]  ;;  %v2780_v56 = vld [vmem:[%s4441_s1 + $0xe0] ss:$8 sps:$4 sm:$0xff]   ;;  %vm424_vm7 = vmpackc.low %vm3234_vm6, %vm3234_vm6  ;;  %v383_v58 = vrot.slane %v3232_v50, 7  ;;  %v386_v62 = vrot.slane %v3243_v54, 7  ;;  %v388_v63 = vrot.slane %v3246_v55, 7 }
  0x1d   : > { %v395_v59 = vrot.slane %v3240_v53, 7  ;;  %v2781_v61 = vld [vmem:[%s4441_s1 + $0xf4] ss:$8 sps:$4 sm:$0xff]   ;;  %v432_v0 = vsel %vm424_vm7, 65537, %v3049_v24  ;;  %v2783_v1 = vld [vmem:[%s4441_s1 + $0xf0] ss:$8 sps:$4 sm:$0xff]  }
  0x1e   : > { %v2786_v2 = vld [vmem:[%s4441_s1 + $0x104] ss:$8 sps:$4 sm:$0xff]   ;;  %v410_v4 = vsel %vm397_vm1, %v381_v57, %v383_v58  ;;  %vm3279_vm8 = vcmp.gt.s32.totalorder %v293_v60, 0  ;;  %v407_v8 = vsel %vm397_vm1, %v386_v62, %v388_v63  ;;  %v409_v10 = vsel %vm397_vm1, %v384_v21, %v386_v62  ;;  %v3291_v12 = vld [vmem:[%s3132_s22 + $0x30] sm:$0xff]  ;;  %v2802_v42 = vld [vmem:[%s4441_s1 + $0x160] ss:$8 sps:$4 sm:$0xff]  }
  0x1f   : > { %1140 = vmatpush1.bf16.msra.mxu0 %v2750_v11  ;;  %v412_v5 = vsel %vm397_vm1, %v395_v59, %v381_v57  ;;  %v3277_v6 = vld [vmem:[%s3132_s22 + $0x20] sm:$0xff]  ;;  %v2395_v11 = vcombine.low %v432_v0, %v3172_v28  ;;  %v3298_v15 = vld [vmem:[%s3132_s22 + $0x48] sm:$0xff]  ;;  %vm426_vm9 = vmpackc.low %vm3279_vm8, %vm3279_vm8  ;;  %v307_v21 = vand.u32 15, %v259_v3  ;;  %v417_v25 = vpack.c.bf16 %v407_v8, %v409_v10 }
  0x20   : > { %1141 = vmatprep.subr.bf16.mxu0 %v2751_v13  ;;  %v254_v13 = vadd.s32 8, %v3114_v9  ;;  %v414_v20 = vpack.c.bf16 %v410_v4, %v412_v5  ;;  %v387_v27 = vrot.slane %v3291_v12, 7  ;;  %v390_v31 = vrot.slane %v3298_v15, 7  ;;  %v3356_v51 = vld [vmem:[%s3132_s22 + $0x68] sm:$0xff]  ;;  %v2883_v52 = vld [vmem:[%s4442_s2 + $0x14] ss:$8 sps:$4 sm:$0xff]  }
  0x21   : > { %vm3312_vm10 = vcmp.ne.s16.totalorder %v2395_v11, 0  ;;  %vm3336_vm11 = vcmp.gt.s32.totalorder %v307_v21, 0  ;;  %v258_v62 = vadd.s32 40, %v3114_v9  ;;  %v394_v0 = vrot.slane %v3356_v51, 7  ;;  %v2798_v8 = vld [vmem:[%s4441_s1 + $0x144] ss:$8 sps:$4 sm:$0xff]  }
  0x22   : > { %vm428_vm14 = vmpackc.low %vm3336_vm11, %vm3336_vm11  ;;  %v2934_v33 = vld [vmem:[%s4442_s2 + $0x120] ss:$8 sps:$4 sm:$0xff]   ;;  %v2945_v30 = vld [vmem:[%s4442_s2 + $0x154] ss:$8 sps:$4 sm:$0xff]  }
  0x23   : > { %1142 = vmatpush1.bf16.msra.mxu0 %v2753_v14  ;;  %v2784_v14 = vld [vmem:[%s4441_s1 + $0x100] ss:$8 sps:$4 sm:$0xff]   ;;  %v436_v3 = vsel %vm428_vm14, 65537, %v3049_v24  ;;  %v300_v7 = vand.u32 15, %v258_v62  ;;  %v2886_v62 = vld [vmem:[%s4442_s2 + $0x24] ss:$8 sps:$4 sm:$0xff]  }
  0x24   : > { %1143 = vmatprep.subr.bf16.mxu0 %v2754_v16  ;;  %v3301_v16 = vld [vmem:[%s3132_s22 + $0x58] sm:$0xff]  ;;  %v2397_v21 = vcombine.low %v436_v3, %v3172_v28 }
  0x25   : > { %vm370_vm3 = vcmp.lt.s32.totalorder %v300_v7, 15  ;;  %v2811_v3 = vld [vmem:[%s4441_s1 + $0x190] ss:$8 sps:$4 sm:$0xff]   ;;  %v2816_v7 = vld [vmem:[%s4441_s1 + $0x1a4] ss:$8 sps:$4 sm:$0xff]  }
  0x26   : > { %vm508_vm4 = vmpackc.low %vm370_vm3, %vm370_vm3  ;;  %vm3430_vm6 = vcmp.ne.s16.totalorder %v2397_v21, 0  ;;  %v2895_v21 = vld [vmem:[%s4442_s2 + $0x54] ss:$8 sps:$4 sm:$0xff]  }
  0x27   : > { %1144 = vmatpush1.bf16.msra.mxu0 %v2756_v22  ;;  %v2789_v22 = vld [vmem:[%s4441_s1 + $0x114] ss:$8 sps:$4 sm:$0xff]  }
  0x28   : > { %1145 = vmatprep.subr.bf16.mxu0 %v2757_v26  ;;  %v385_v26 = vrot.slane %v3277_v6, 7 }
  0x2b   : > { %1146 = vmatpush1.bf16.msra.mxu0 %v2759_v32  ;;  %v392_v32 = vrot.slane %v3301_v16, 7 }
  0x2c   : > { %1147 = vmatprep.subr.bf16.mxu0 %v2760_v34  ;;  %v272_v34 = vand.u32 15, %v254_v13 }
  0x2e   : > { %vm3348_vm12 = vcmp.lt.s32.totalorder %v272_v34, 15  ;;  %v260_v34 = vadd.s32 56, %v3114_v9 }
  0x2f   : > { %1148 = vmatpush1.bf16.msra.mxu0 %v2762_v35  ;;  %v434_v35 = vsel %vm426_vm9, 65537, %v3049_v24  ;;  %vm504_vm15 = vmpackc.low %vm3348_vm12, %vm3348_vm12  ;;  %vm478_vm9 = vcmp.lt.s32.totalorder %v3114_v9, 7 }
  0x30   : > { %1149 = vmatprep.subr.bf16.mxu0 %v2763_v36  ;;  %v286_v36 = vand.u32 15, %v256_v29  ;;  %v2396_v45 = vcombine.low %v434_v35, %v3172_v28  ;;  %v2952_v35 = vld [vmem:[%s4442_s2 + $0x180] ss:$8 sps:$4 sm:$0xff]  }
  0x32   : > { %vm3358_vm13 = vcmp.lt.s32.totalorder %v286_v36, 15  ;;  %vm3374_vm0 = vcmp.ne.s16.totalorder %v2396_v45, 0  ;;  %v2799_v36 = vld [vmem:[%s4441_s1 + $0x150] ss:$8 sps:$4 sm:$0xff]  }
  0x33   : > { %1150 = vmatpush1.bf16.msra.mxu0 %v2765_v37  ;;  %v2787_v37 = vld [vmem:[%s4441_s1 + $0x110] ss:$8 sps:$4 sm:$0xff]   ;;  %vm506_vm2 = vmpackc.low %vm3358_vm13, %vm3358_vm13 }
  0x34   : > { %1151 = vmatprep.subr.bf16.mxu0 %v2766_v38  ;;  %v2792_v38 = vld [vmem:[%s4441_s1 + $0x124] ss:$8 sps:$4 sm:$0xff]   ;;  %v3392_v5 = vsel %vm506_vm2, 65537, %v3049_v24 }
  0x35   : > { %v2399_v10 = vcombine.low %v3172_v28, %v3392_v5 }
  0x37   : > { %1152 = vmatpush1.bf16.msra.mxu0 %v2768_v39  ;;  %v406_v39 = vsel %vm397_vm1, %v385_v26, %v387_v27  ;;  %vm3709_vm12 = vcmp.ne.s16.totalorder %v2399_v10, 0 }
  0x38   : > { %1153 = vmatprep.subr.bf16.mxu0 %v2769_v40  ;;  %v408_v40 = vsel %vm397_vm1, %v383_v58, %v385_v26  ;;  %v3421_v26 = vsel %vm508_vm4, 65537, %v3049_v24 }
  0x39   : > { %v416_v57 = vpack.c.bf16 %v406_v39, %v408_v40 }
  0x3b   : > { %1154 = vmatpush1.bf16.msra.mxu0 %v2771_v41  ;;  %v3334_v41 = vld [vmem:[%s3132_s22 + $0x40] sm:$0xff] }
  0x3c   : > { %1155 = vmatprep.subr.bf16.mxu0 %v2772_v43  ;;  %v403_v43 = vsel %vm397_vm1, %v390_v31, %v392_v32  ;;  %v389_v60 = vrot.slane %v3334_v41, 7 }
  0x3e   : > { %v404_v13 = vsel %vm397_vm1, %v387_v27, %v389_v60  ;;  %v2801_v27 = vld [vmem:[%s4441_s1 + $0x154] ss:$8 sps:$4 sm:$0xff]  }
  0x3f   : > { %1156 = vmatpush1.bf16.msra.mxu0 %v2774_v44  ;;  %v405_v44 = vsel %vm397_vm1, %v388_v63, %v390_v31  ;;  %v2951_v63 = vld [vmem:[%s4442_s2 + $0x174] ss:$8 sps:$4 sm:$0xff]  }
  0x40   : > { %1157 = vmatprep.subr.bf16.mxu0 %v2775_v46  ;;  %v3346_v46 = vld [vmem:[%s3132_s22 + $0x50] sm:$0xff]  ;;  %v419_v58 = vpack.c.bf16 %v403_v43, %v405_v44 }
  0x41   : > { %v2807_v44 = vld [vmem:[%s4441_s1 + $0x174] ss:$8 sps:$4 sm:$0xff]  }
  0x43   : > { %1158 = vmatpush1.bf16.msra.mxu0 %v2777_v47  ;;  %v374_v47 = vpack.c.bf16 %v3148_v18, %v3145_v17 }
  0x44   : > { %1159 = vmatprep.subr.bf16.mxu0 %v2778_v48  ;;  %v2790_v48 = vld [vmem:[%s4441_s1 + $0x120] ss:$8 sps:$4 sm:$0xff]  }
  0x47   : > { %1160 = vmatpush1.bf16.msra.mxu0 %v2780_v56  ;;  %v2795_v56 = vld [vmem:[%s4441_s1 + $0x134] ss:$8 sps:$4 sm:$0xff]  }
  0x48   : > { %1161 = vmatprep.subr.bf16.mxu0 %v2781_v61  ;;  %v391_v61 = vrot.slane %v3346_v46, 7 }
  0x4a   : > { %v402_v11 = vsel %vm397_vm1, %v389_v60, %v391_v61  ;;  %v2808_v60 = vld [vmem:[%s4441_s1 + $0x180] ss:$8 sps:$4 sm:$0xff]  }
  0x4b   : > { %1162 = vmatpush1.bf16.msra.mxu0 %v2783_v1  ;;  %v3380_v1 = vsel %vm504_vm15, 65537, %v3049_v24  ;;  %v418_v29 = vpack.c.bf16 %v402_v11, %v404_v13  ;;  %v2892_v11 = vld [vmem:[%s4442_s2 + $0x44] ss:$8 sps:$4 sm:$0xff]   ;;  %v2814_v13 = vld [vmem:[%s4441_s1 + $0x1a0] ss:$8 sps:$4 sm:$0xff]  }
  0x4c   : > { %1204 = vmatprep.subr.bf16.mxu0 %v2786_v2  ;;  %v2793_v2 = vld [vmem:[%s4441_s1 + $0x130] ss:$8 sps:$4 sm:$0xff]   ;;  %v2398_v4 = vcombine.low %v3172_v28, %v3380_v1  ;;  %v2856_v1 = vld [vmem:[%s4441_s1 + $0x280] ss:$8 sps:$4 sm:$0xff]  }
  0x4e   : > { %2499 = vmatmul.mubr.msk.bf16.vlgmr.msra.gmra.mrb[0].mxu0 %vm3182_vm5, %v414_v20  ;;  %v399_v20 = vsel %vm397_vm1, %v394_v0, %v396_v23  ;;  %v2400_v23 = vcombine.low %v3172_v28, %v3421_v26  ;;  %vm3632_vm11 = vcmp.ne.s16.totalorder %v2398_v4, 0  ;;  %v2861_v4 = vld [vmem:[%s4441_s1 + $0x294] ss:$8 sps:$4 sm:$0xff]  }
  0x4f   : > { %1205 = vmatpush1.bf16.msra.mxu0 %v2784_v14  ;;  %2500 = vmatprep.mubr.msk.bf16.mxu0 %vm3312_vm10, %v417_v25  ;;  %v3408_v14 = vld [vmem:[%s3132_s22 + $0x60] sm:$0xff] }
  0x50   : > { %1206 = vmatprep.subr.bf16.mxu0 %v2789_v22  ;;  %v401_v22 = vsel %vm397_vm1, %v392_v32, %v394_v0  ;;  %v2796_v25 = vld [vmem:[%s4441_s1 + $0x140] ss:$8 sps:$4 sm:$0xff]   ;;  %v393_v32 = vrot.slane %v3408_v14, 7  ;;  %vm3732_vm13 = vcmp.ne.s16.totalorder %v2400_v23, 0 }
  0x51   : > { %v421_v31 = vpack.c.bf16 %v399_v20, %v401_v22  ;;  %v2888_v0 = vld [vmem:[%s4442_s2 + $0x20] ss:$8 sps:$4 sm:$0xff]   ;;  %v2819_v20 = vld [vmem:[%s4441_s1 + $0x1b4] ss:$8 sps:$4 sm:$0xff]  }
  0x52   : > { %v398_v39 = vsel %vm397_vm1, %v393_v32, %v395_v59  ;;  %v400_v40 = vsel %vm397_vm1, %v391_v61, %v393_v32  ;;  %v2813_v61 = vld [vmem:[%s4441_s1 + $0x194] ss:$8 sps:$4 sm:$0xff]   ;;  %v2894_v22 = vld [vmem:[%s4442_s2 + $0x40] ss:$8 sps:$4 sm:$0xff]  }
  0x53   : > { %1207 = vmatpush1.bf16.msra.mxu0 %v2787_v37  ;;  %v314_v37 = vand.u32 15, %v260_v34  ;;  %v420_v45 = vpack.c.bf16 %v398_v39, %v400_v40  ;;  %v2820_v32 = vld [vmem:[%s4441_s1 + $0x1c0] ss:$8 sps:$4 sm:$0xff]   ;;  %v2825_v34 = vld [vmem:[%s4441_s1 + $0x1d4] ss:$8 sps:$4 sm:$0xff]  }
  0x54   : > { %1208 = vmatprep.subr.bf16.mxu0 %v2792_v38  ;;  %v2804_v38 = vld [vmem:[%s4441_s1 + $0x164] ss:$8 sps:$4 sm:$0xff]   ;;  %v2826_v39 = vld [vmem:[%s4441_s1 + $0x1e0] ss:$8 sps:$4 sm:$0xff]   ;;  %v2831_v40 = vld [vmem:[%s4441_s1 + $0x1f4] ss:$8 sps:$4 sm:$0xff]  }
  0x55   : > { %vm372_vm7 = vcmp.lt.s32.totalorder %v314_v37, 15  ;;  %v2823_v37 = vld [vmem:[%s4441_s1 + $0x1d0] ss:$8 sps:$4 sm:$0xff]  }
  0x56   : > { %2501 = vmatmul.mubr.msk.bf16.gmra.mrb[4].mxu0 %vm3312_vm10, %v416_v57  ;;  %vm510_vm8 = vmpackc.low %vm372_vm7, %vm372_vm7  ;;  %v2810_v57 = vld [vmem:[%s4441_s1 + $0x184] ss:$8 sps:$4 sm:$0xff]  }
  0x57   : > { %1209 = vmatpush1.bf16.msra.mxu0 %v2790_v48  ;;  %2502 = vmatprep.mubr.msk.bf16.mxu0 %vm3374_vm0, %v419_v58  ;;  %v3454_v43 = vsel %vm510_vm8, 65537, %v3049_v24  ;;  %v2880_v24 = vld [vmem:[%s4442_s2 + $0x4] ss:$8 sps:$4 sm:$0xff]   ;;  %v2882_v48 = vld [vmem:[%s4442_s2] ss:$8 sps:$4 sm:$0xff]  }
  0x58   : > { %1210 = vmatprep.subr.bf16.mxu0 %v2795_v56  ;;  %v2401_v59 = vcombine.low %v3172_v28, %v3454_v43  ;;  %v2805_v56 = vld [vmem:[%s4441_s1 + $0x170] ss:$8 sps:$4 sm:$0xff]   ;;  %2058 = vmatprep.subr.bf16.mxu1 %v2880_v24  ;;  %v376_v24 = vpack.c.bf16 %v3246_v55, %v3243_v54  ;;  %v2901_v28 = vld [vmem:[%s4442_s2 + $0x74] ss:$8 sps:$4 sm:$0xff]  }
  0x59   : > { %2059 = vmatpush1.bf16.msra.mxu1 %v2882_v48  ;;  %v2885_v58 = vld [vmem:[%s4442_s2 + $0x10] ss:$8 sps:$4 sm:$0xff]   ;;  %v2837_v48 = vld [vmem:[%s4441_s1 + $0x214] ss:$8 sps:$4 sm:$0xff]  }
  0x5a   : > { %2060 = vmatprep.subr.bf16.mxu1 %v2883_v52  ;;  %v2835_v52 = vld [vmem:[%s4441_s1 + $0x210] ss:$8 sps:$4 sm:$0xff]   ;;  %vm3758_vm14 = vcmp.ne.s16.totalorder %v2401_v59, 0  ;;  %v2904_v59 = vld [vmem:[%s4442_s2 + $0x84] ss:$8 sps:$4 sm:$0xff]  }
  0x5b   : > { %1211 = vmatpush1.bf16.msra.mxu0 %v2793_v2  ;;  %v2889_v2 = vld [vmem:[%s4442_s2 + $0x34] ss:$8 sps:$4 sm:$0xff]   ;;  %v2903_v43 = vld [vmem:[%s4442_s2 + $0x70] ss:$8 sps:$4 sm:$0xff]  }
  0x5c   : > { %1212 = vmatprep.subr.bf16.mxu0 %v2798_v8  ;;  %v2891_v8 = vld [vmem:[%s4442_s2 + $0x30] ss:$8 sps:$4 sm:$0xff]  }
  0x5d   : > { %2061 = vmatpush1.bf16.msra.mxu1 %v2885_v58  ;;  %v2838_v58 = vld [vmem:[%s4441_s1 + $0x220] ss:$8 sps:$4 sm:$0xff]  }
  0x5e   : > { %2503 = vmatmul.mubr.msk.bf16.gmra.mrb[8].mxu0 %vm3374_vm0, %v418_v29  ;;  %2062 = vmatprep.subr.bf16.mxu1 %v2886_v62  ;;  %v2897_v29 = vld [vmem:[%s4442_s2 + $0x50] ss:$8 sps:$4 sm:$0xff]  }
  0x5f   : > { %1213 = vmatpush1.bf16.msra.mxu0 %v2796_v25  ;;  %2504 = vmatprep.mubr.msk.bf16.mxu0 %vm3430_vm6, %v421_v31  ;;  %v2817_v25 = vld [vmem:[%s4441_s1 + $0x1b0] ss:$8 sps:$4 sm:$0xff]   ;;  %v2898_v31 = vld [vmem:[%s4442_s2 + $0x64] ss:$8 sps:$4 sm:$0xff]  }
  0x60   : > { %1214 = vmatprep.subr.bf16.mxu0 %v2801_v27  ;;  %v2822_v27 = vld [vmem:[%s4441_s1 + $0x1c4] ss:$8 sps:$4 sm:$0xff]   ;;  %v2841_v62 = vld [vmem:[%s4441_s1 + $0x230] ss:$8 sps:$4 sm:$0xff]  }
  0x61   : > { %2063 = vmatpush1.bf16.msra.mxu1 %v2888_v0  ;;  %v2846_v0 = vld [vmem:[%s4441_s1 + $0x244] ss:$8 sps:$4 sm:$0xff]  }
  0x62   : > { %2064 = vmatprep.subr.bf16.mxu1 %v2889_v2  ;;  %v377_v2 = vpack.c.bf16 %v3346_v46, %v3334_v41 }
  0x63   : > { %1215 = vmatpush1.bf16.msra.mxu0 %v2799_v36  ;;  %v2900_v36 = vld [vmem:[%s4442_s2 + $0x60] ss:$8 sps:$4 sm:$0xff]  }
  0x64   : > { %1216 = vmatprep.subr.bf16.mxu0 %v2804_v38  ;;  %v2828_v38 = vld [vmem:[%s4441_s1 + $0x1e4] ss:$8 sps:$4 sm:$0xff]  }
  0x65   : > { %2065 = vmatpush1.bf16.msra.mxu1 %v2891_v8  ;;  %v2849_v8 = vld [vmem:[%s4441_s1 + $0x254] ss:$8 sps:$4 sm:$0xff]  }
  0x66   : > { %2505 = vmatmul.mubr.msk.bf16.gmra.mrb[12].mxu0 %vm3430_vm6, %v420_v45  ;;  %2066 = vmatprep.subr.bf16.mxu1 %v2892_v11  ;;  %v373_v45 = vpack.c.bf16 %v3232_v50, %v3229_v49  ;;  %v463_v11 = vrot.slane %v3145_v17, 1 }
  0x67   : > { %1217 = vmatpush1.bf16.msra.mxu0 %v2802_v42  ;;  %1236 = vmatprep.mubr.bf16.mxu0 %v374_v47  ;;  %v2829_v42 = vld [vmem:[%s4441_s1 + $0x1f0] ss:$8 sps:$4 sm:$0xff]   ;;  %v2832_v47 = vld [vmem:[%s4441_s1 + $0x200] ss:$8 sps:$4 sm:$0xff]  }
  0x68   : > { %1218 = vmatprep.subr.bf16.mxu0 %v2807_v44  ;;  %v2834_v44 = vld [vmem:[%s4441_s1 + $0x204] ss:$8 sps:$4 sm:$0xff]  }
  0x69   : > { %2067 = vmatpush1.bf16.msra.mxu1 %v2894_v22  ;;  %v2847_v22 = vld [vmem:[%s4441_s1 + $0x250] ss:$8 sps:$4 sm:$0xff]  }
  0x6a   : > { %2068 = vmatprep.subr.bf16.mxu1 %v2895_v21 }
  0x6b   : > { %1219 = vmatpush1.bf16.msra.mxu0 %v2805_v56  ;;  %v2840_v56 = vld [vmem:[%s4441_s1 + $0x224] ss:$8 sps:$4 sm:$0xff]  }
  0x6c   : > { %1220 = vmatprep.subr.bf16.mxu0 %v2810_v57  ;;  %v375_v57 = vpack.c.bf16 %v3291_v12, %v3277_v6 }
  0x6d   : > { %2069 = vmatpush1.bf16.msra.mxu1 %v2897_v29 }
  0x6e   : > { %2070 = vmatprep.subr.bf16.mxu1 %v2898_v31  ;;  %v2855_v31 = vld [vmem:[%s4441_s1 + $0x274] ss:$8 sps:$4 sm:$0xff]  }
  0x6f   : > { %1221 = vmatpush1.bf16.msra.mxu0 %v2808_v60  ;;  %v378_v60 = vpack.c.bf16 %v3301_v16, %v3298_v15 }
  0x70   : > { %1222 = vmatprep.subr.bf16.mxu0 %v2813_v61  ;;  %v2843_v61 = vld [vmem:[%s4441_s1 + $0x234] ss:$8 sps:$4 sm:$0xff]  }
  0x71   : > { %2071 = vmatpush1.bf16.msra.mxu1 %v2900_v36  ;;  %v2858_v36 = vld [vmem:[%s4441_s1 + $0x284] ss:$8 sps:$4 sm:$0xff]  }
  0x72   : > { %2072 = vmatprep.subr.bf16.mxu1 %v2901_v28 }
  0x73   : > { %1223 = vmatpush1.bf16.msra.mxu0 %v2811_v3  ;;  %v2844_v3 = vld [vmem:[%s4441_s1 + $0x240] ss:$8 sps:$4 sm:$0xff]  }
  0x74   : > { %1224 = vmatprep.subr.bf16.mxu0 %v2816_v7  ;;  %v380_v7 = vpack.c.bf16 %v3152_v19, %v3356_v51  ;;  %v2852_v19 = vld [vmem:[%s4441_s1 + $0x264] ss:$8 sps:$4 sm:$0xff]  }
  0x75   : > { %2073 = vmatpush1.bf16.msra.mxu1 %v2903_v43 }
  0x76   : > { %2074 = vmatprep.subr.bf16.mxu1 %v2904_v59 }
  0x77   : > { %1225 = vmatpush1.bf16.msra.mxu0 %v2814_v13  ;;  %v465_v13 = vrot.slane %v3148_v18, 1 }
  0x78   : > { %1226 = vmatprep.subr.bf16.mxu0 %v2819_v20  ;;  %v467_v20 = vrot.slane %v3243_v54, 1  ;;  %v473_v54 = vrot.slane %v3301_v16, 1 }
  0x79   : > { %v492_v21 = vsel %vm478_vm9, %v463_v11, %v465_v13 }
  0x7a   : > { %v490_v18 = vsel %vm478_vm9, %v465_v13, %v467_v20  ;;  %v475_v13 = vrot.slane %v3356_v51, 1 }
  0x7b   : > { %1227 = vmatpush1.bf16.msra.mxu0 %v2817_v25  ;;  %v379_v25 = vpack.c.bf16 %v3240_v53, %v3408_v14  ;;  %v496_v29 = vpack.c.bf16 %v490_v18, %v492_v21  ;;  %v3737_v18 = vld [vmem:[%s3132_s22 + $0x78] sm:$0xff] }
  0x7c   : > { %1228 = vmatprep.subr.bf16.mxu0 %v2822_v27  ;;  %v2850_v27 = vld [vmem:[%s4441_s1 + $0x260] ss:$8 sps:$4 sm:$0xff]   ;;  %v482_v5 = vsel %vm478_vm9, %v473_v54, %v475_v13  ;;  %4483 = vst [vmem:[#allocation3_spill] sm:$0xff] %v3737_v18  ;;  %v477_v21 = vrot.slane %v3737_v18, 1 }
  0x7e   : > { %v480_v26 = vsel %vm478_vm9, %v475_v13, %v477_v21  ;;  %v494_v23 = vsel %vm478_vm9, %v477_v21, %v463_v11 }
  0x7f   : > { %1229 = vmatpush1.bf16.msra.mxu0 %v2820_v32 }
  0x80   : > { %1230 = vmatprep.subr.bf16.mxu0 %v2825_v34  ;;  %v2853_v34 = vld [vmem:[%s4441_s1 + $0x270] ss:$8 sps:$4 sm:$0xff]  }
  0x83   : > { %1231 = vmatpush1.bf16.msra.mxu0 %v2823_v37  ;;  %v2859_v37 = vld [vmem:[%s4441_s1 + $0x290] ss:$8 sps:$4 sm:$0xff]  }
  0x84   : > { %1232 = vmatprep.subr.bf16.mxu0 %v2828_v38  ;;  %v2864_v38 = vld [vmem:[%s4441_s1 + $0x2a4] ss:$8 sps:$4 sm:$0xff]  }
  0x87   : > { %1233 = vmatpush1.bf16.msra.mxu0 %v2826_v39  ;;  %v2862_v39 = vld [vmem:[%s4441_s1 + $0x2a0] ss:$8 sps:$4 sm:$0xff]  }
  0x88   : > { %1234 = vmatprep.subr.bf16.mxu0 %v2831_v40  ;;  %v2867_v40 = vld [vmem:[%s4441_s1 + $0x2b4] ss:$8 sps:$4 sm:$0xff]  }
  0x8b   : > { %1235 = vmatpush1.bf16.msra.mxu0 %v2829_v42  ;;  %v2865_v42 = vld [vmem:[%s4441_s1 + $0x2b0] ss:$8 sps:$4 sm:$0xff]  }
  0x8c   : > { %1277 = vmatprep.subr.bf16.mxu0 %v2834_v44  ;;  %v2870_v44 = vld [vmem:[%s4441_s1 + $0x2c4] ss:$8 sps:$4 sm:$0xff]  }
  0x8e   : > { %1237 = vmatmul.mubr.bf16.vlgmr.msra.gmra.mrb[0].mxu0 %v373_v45  ;;  %v2868_v45 = vld [vmem:[%s4441_s1 + $0x2c0] ss:$8 sps:$4 sm:$0xff]  }
  0x8f   : > { %1278 = vmatpush1.bf16.msra.mxu0 %v2832_v47  ;;  %1246 = vmatprep.mubr.bf16.mxu0 %v376_v24  ;;  %v2873_v47 = vld [vmem:[%s4441_s1 + $0x2d4] ss:$8 sps:$4 sm:$0xff]   ;;  %v2871_v24 = vld [vmem:[%s4441_s1 + $0x2d0] ss:$8 sps:$4 sm:$0xff]  }
  0x90   : > { %1279 = vmatprep.subr.bf16.mxu0 %v2837_v48  ;;  %v2876_v48 = vld [vmem:[%s4441_s1 + $0x2e4] ss:$8 sps:$4 sm:$0xff]  }
  0x93   : > { %1280 = vmatpush1.bf16.msra.mxu0 %v2835_v52  ;;  %v462_v52 = vrot.slane %v3229_v49, 1  ;;  %v2877_v49 = vld [vmem:[%s4441_s1 + $0x2f0] ss:$8 sps:$4 sm:$0xff]  }
  0x94   : > { %1281 = vmatprep.subr.bf16.mxu0 %v2840_v56  ;;  %v464_v56 = vrot.slane %v3232_v50, 1 }
  0x96   : > { %1247 = vmatmul.mubr.bf16.gmra.mrb[4].mxu0 %v375_v57  ;;  %v466_v57 = vrot.slane %v3277_v6, 1  ;;  %v491_v6 = vsel %vm478_vm9, %v462_v52, %v464_v56 }
  0x97   : > { %1282 = vmatpush1.bf16.msra.mxu0 %v2838_v58  ;;  %1256 = vmatprep.mubr.bf16.mxu0 %v378_v60  ;;  %v2874_v58 = vld [vmem:[%s4441_s1 + $0x2e0] ss:$8 sps:$4 sm:$0xff]   ;;  %v2879_v60 = vld [vmem:[%s4441_s1 + $0x2f4] ss:$8 sps:$4 sm:$0xff]  }
  0x98   : > { %1283 = vmatprep.subr.bf16.mxu0 %v2843_v61  ;;  %v469_v61 = vrot.slane %v3246_v55, 1  ;;  %v489_v50 = vsel %vm478_vm9, %v464_v56, %v466_v57  ;;  %v2930_v56 = vld [vmem:[%s4442_s2 + $0x104] ss:$8 sps:$4 sm:$0xff]  }
  0x9a   : > { %v488_v55 = vsel %vm478_vm9, %v467_v20, %v469_v61  ;;  %v472_v20 = vrot.slane %v3346_v46, 1 }
  0x9b   : > { %1284 = vmatpush1.bf16.msra.mxu0 %v2841_v62  ;;  %v471_v62 = vrot.slane %v3298_v15, 1  ;;  %v495_v15 = vpack.c.bf16 %v489_v50, %v491_v6 }
  0x9c   : > { %1285 = vmatprep.subr.bf16.mxu0 %v2846_v0 }
  0x9d   : > { %v486_v0 = vsel %vm478_vm9, %v469_v61, %v471_v62  ;;  %v484_v16 = vsel %vm478_vm9, %v471_v62, %v473_v54 }
  0x9e   : > { %1257 = vmatmul.mubr.bf16.gmra.mrb[8].mxu0 %v377_v2  ;;  %v498_v2 = vpack.c.bf16 %v486_v0, %v488_v55  ;;  %v500_v51 = vpack.c.bf16 %v482_v5, %v484_v16 }
  0x9f   : > { %1286 = vmatpush1.bf16.msra.mxu0 %v2844_v3  ;;  %1266 = vmatprep.mubr.bf16.mxu0 %v380_v7  ;;  %v468_v3 = vrot.slane %v3291_v12, 1  ;;  %v470_v7 = vrot.slane %v3334_v41, 1 }
  0xa0   : > { %1287 = vmatprep.subr.bf16.mxu0 %v2849_v8  ;;  %v1566_v8 = vld [vmem:[%s4444_s4] sm:$0x3] }
  0xa1   : > { %v485_v12 = vsel %vm478_vm9, %v468_v3, %v470_v7  ;;  %v487_v41 = vsel %vm478_vm9, %v466_v57, %v468_v3  ;;  %v4447_v57 = vsub.s32 0, %v3114_v9 }
  0xa2   : > { %v497_v10 = vpack.c.bf16 %v485_v12, %v487_v41 }
  0xa3   : > { %1288 = vmatpush1.bf16.msra.mxu0 %v2847_v22  ;;  %v474_v22 = vrot.slane %v3408_v14, 1  ;;  %v483_v14 = vsel %vm478_vm9, %v470_v7, %v472_v20 }
  0xa4   : > { %1289 = vmatprep.subr.bf16.mxu0 %v2852_v19  ;;  %v4480_v19 = vmov 0 }
  0xa5   : > { %v4481_v19 = vsel %vm3732_vm13, 4294967295, %v4480_v19  ;;  %v481_v46 = vsel %vm478_vm9, %v472_v20, %v474_v22 }
  0xa6   : > { %1267 = vmatmul.mubr.bf16.gmra.mrb[12].mxu0 %v379_v25  ;;  %4482 = vst [vmem:[#allocation2_spill] sm:$0xff] %v4481_v19  ;;  %v499_v25 = vpack.c.bf16 %v481_v46, %v483_v14 }
  0xa7   : > { %1290 = vmatpush1.bf16.msra.mxu0 %v2850_v27  ;;  %2506 = vmatprep.mubr.msk.bf16.mxu0 %vm3632_vm11, %v496_v29  ;;  %v502_v27 = vpack.c.bf16 %v494_v23, %v480_v26  ;;  %v476_v29 = vrot.slane %v3240_v53, 1 }
  0xa8   : > { %1291 = vmatprep.subr.bf16.mxu0 %v2855_v31  ;;  %v4484_v31 = vmov 0 }
  0xa9   : > { %v4485_v31 = vsel %vm3758_vm14, 4294967295, %v4484_v31  ;;  %v479_v17 = vsel %vm478_vm9, %v474_v22, %v476_v29  ;;  %v493_v11 = vsel %vm478_vm9, %v476_v29, %v462_v52  ;;  %v2927_v52 = vld [vmem:[%s4442_s2 + $0xf0] ss:$8 sps:$4 sm:$0xff]  }
  0xaa   : > { %4486 = vst [vmem:[#allocation4_spill] sm:$0xff] %v4485_v31  ;;  %v501_v53 = vpack.c.bf16 %v493_v11, %v479_v17 }
  0xab   : > { %1292 = vmatpush1.bf16.msra.mxu0 %v2853_v34  ;;  %v2906_v34 = vld [vmem:[%s4442_s2 + $0x80] ss:$8 sps:$4 sm:$0xff]  }
  0xac   : > { %1293 = vmatprep.subr.bf16.mxu0 %v2858_v36  ;;  %2075 = vmatpush1.bf16.msra.mxu1 %v2906_v34  ;;  %v2907_v36 = vld [vmem:[%s4442_s2 + $0x94] ss:$8 sps:$4 sm:$0xff]  }
  0xad   : > { %2076 = vmatprep.subr.bf16.mxu1 %v2907_v36 }
  0xaf   : > { %1294 = vmatpush1.bf16.msra.mxu0 %v2856_v1  ;;  %v2909_v1 = vld [vmem:[%s4442_s2 + $0x90] ss:$8 sps:$4 sm:$0xff]  }
  0xb0   : > { %1295 = vmatprep.subr.bf16.mxu0 %v2861_v4  ;;  %2077 = vmatpush1.bf16.msra.mxu1 %v2909_v1  ;;  %v2910_v4 = vld [vmem:[%s4442_s2 + $0xa4] ss:$8 sps:$4 sm:$0xff]  }
  0xb1   : > { %2078 = vmatprep.subr.bf16.mxu1 %v2910_v4 }
  0xb3   : > { %1296 = vmatpush1.bf16.msra.mxu0 %v2859_v37  ;;  %v2912_v37 = vld [vmem:[%s4442_s2 + $0xa0] ss:$8 sps:$4 sm:$0xff]  }
  0xb4   : > { %1297 = vmatprep.subr.bf16.mxu0 %v2864_v38  ;;  %2079 = vmatpush1.bf16.msra.mxu1 %v2912_v37  ;;  %v2913_v38 = vld [vmem:[%s4442_s2 + $0xb4] ss:$8 sps:$4 sm:$0xff]  }
  0xb5   : > { %2080 = vmatprep.subr.bf16.mxu1 %v2913_v38 }
  0xb7   : > { %1298 = vmatpush1.bf16.msra.mxu0 %v2862_v39  ;;  %v2915_v39 = vld [vmem:[%s4442_s2 + $0xb0] ss:$8 sps:$4 sm:$0xff]  }
  0xb8   : > { %1299 = vmatprep.subr.bf16.mxu0 %v2867_v40  ;;  %2081 = vmatpush1.bf16.msra.mxu1 %v2915_v39  ;;  %v2916_v40 = vld [vmem:[%s4442_s2 + $0xc4] ss:$8 sps:$4 sm:$0xff]  }
  0xb9   : > { %2082 = vmatprep.subr.bf16.mxu1 %v2916_v40 }
  0xbb   : > { %1300 = vmatpush1.bf16.msra.mxu0 %v2865_v42  ;;  %v2918_v42 = vld [vmem:[%s4442_s2 + $0xc0] ss:$8 sps:$4 sm:$0xff]  }
  0xbc   : > { %1301 = vmatprep.subr.bf16.mxu0 %v2870_v44  ;;  %2083 = vmatpush1.bf16.msra.mxu1 %v2918_v42  ;;  %v2919_v44 = vld [vmem:[%s4442_s2 + $0xd4] ss:$8 sps:$4 sm:$0xff]  }
  0xbd   : > { %2084 = vmatprep.subr.bf16.mxu1 %v2919_v44 }
  0xbf   : > { %1302 = vmatpush1.bf16.msra.mxu0 %v2868_v45  ;;  %v2921_v45 = vld [vmem:[%s4442_s2 + $0xd0] ss:$8 sps:$4 sm:$0xff]  }
  0xc0   : > { %1303 = vmatprep.subr.bf16.mxu0 %v2873_v47  ;;  %2085 = vmatpush1.bf16.msra.mxu1 %v2921_v45  ;;  %v2922_v47 = vld [vmem:[%s4442_s2 + $0xe4] ss:$8 sps:$4 sm:$0xff]  }
  0xc1   : > { %2086 = vmatprep.subr.bf16.mxu1 %v2922_v47 }
  0xc3   : > { %1304 = vmatpush1.bf16.msra.mxu0 %v2871_v24  ;;  %v2924_v24 = vld [vmem:[%s4442_s2 + $0xe0] ss:$8 sps:$4 sm:$0xff]  }
  0xc4   : > { %1305 = vmatprep.subr.bf16.mxu0 %v2876_v48  ;;  %2087 = vmatpush1.bf16.msra.mxu1 %v2924_v24  ;;  %v2925_v48 = vld [vmem:[%s4442_s2 + $0xf4] ss:$8 sps:$4 sm:$0xff]  }
  0xc5   : > { %2088 = vmatprep.subr.bf16.mxu1 %v2925_v48 }
  0xc7   : > { %1306 = vmatpush1.bf16.msra.mxu0 %v2874_v58  ;;  %v639_v58 = vld [vmem:[%s4443_s3] sm:$0x3] }
  0xc8   : > { %1307 = vmatprep.subr.bf16.mxu0 %v2879_v60  ;;  %2089 = vmatpush1.bf16.msra.mxu1 %v2927_v52  ;;  %v4446_v60 = vsub.s32 1, %v3114_v9  ;;  %v3836_v61 = vrot.slane %v639_v58, %v4447_v57 }
  0xc9   : > { %2131 = vmatprep.subr.bf16.mxu1 %v2930_v56 }
  0xca   : > { %v3840_v62 = vrot.slane %v639_v58, %v4446_v60 }
  0xcb   : > { %1308 = vmatpush1.bf16.msra.mxu0 %v2877_v49 }
  0xce   : > { %2507 = vmatmul.mubr.msk.bf16.vlgmr.msra.gmra.mrb[0].mxu0 %vm3632_vm11, %v495_v15 }
  0xcf   : > { %2508 = vmatprep.mubr.msk.bf16.mxu0 %vm3709_vm12, %v498_v2 }
  0xd6   : > { %2509 = vmatmul.mubr.msk.bf16.gmra.mrb[4].mxu0 %vm3709_vm12, %v497_v10 }
  0xd7   : > { %2510 = vmatprep.mubr.msk.bf16.mxu0 %vm3732_vm13, %v500_v51 }
  0xde   : > { %2511 = vmatmul.mubr.msk.bf16.gmra.mrb[8].mxu0 %vm3732_vm13, %v499_v25 }
  0xdf   : > { %2512 = vmatprep.mubr.msk.bf16.mxu0 %vm3758_vm14, %v502_v27 }
  0xe6   : > { %2513 = vmatmul.mubr.msk.bf16.gmra.mrb[12].mxu0 %vm3758_vm14, %v501_v53 }
 0x1a1   : > { %v1311_v49 = vpop.f32.mrb[0].mxu0 }
 0x1a2   : > { %v2630_v50 = vadd.f32 %v1311_v49, %v3836_v61  ;;  %v1313_v6 = vpop.f32.mrb[1].mxu0 }
 0x1a3   : > { %v2631_v0 = vadd.f32 %v1313_v6, %v3840_v62  ;;  %v1315_v55 = vpop.f32.mrb[2].mxu0 }
 0x1a4   : > { %v3844_v15 = vmax.f32 %v2630_v50, 0.0  ;;  %v2632_v2 = vadd.f32 %v1315_v55, %v3836_v61  ;;  %v1317_v3 = vpop.f32.mrb[3].mxu0 }
 0x1a5   : > { %v3847_v7 = vmax.f32 %v2631_v0, 0.0  ;;  %v2633_v54 = vadd.f32 %v1317_v3, %v3840_v62 }
 0x1a6   : > { %v3850_v13 = vmax.f32 %v2632_v2, 0.0  ;;  %v1374_v12 = vrot.slane %v3844_v15, 7  ;;  %v4448_v41 = vrot.slane %v3844_v15, 1 }
 0x1a7   : > { %v3854_v5 = vmax.f32 %v2633_v54, 0.0  ;;  %v4450_v16 = vrot.slane %v3847_v7, 7  ;;  %v4449_v22 = vrot.slane %v3847_v7, 1 }
 0x1a8   : > { %v1376_v51 = vrot.slane %v3850_v13, 7  ;;  %v1424_v20 = vrot.slane %v3850_v13, 1 }
 0x1a9   : > { %v1377_v21 = vrot.slane %v3854_v5, 7  ;;  %v1425_v46 = vrot.slane %v3854_v5, 1  ;;  %v1321_v14 = vpop.f32.mrb[4].mxu0 }
 0x1aa   : > { %v3870_v23 = vsel %vm478_vm9, %v4448_v41, %v1424_v20  ;;  %v2634_v25 = vadd.f32 %v1321_v14, %v3836_v61  ;;  %v1323_v27 = vpop.f32.mrb[5].mxu0  ;;  %v3877_v29 = vsel %vm397_vm1, %v1374_v12, %v1376_v51 }
 0x1ab   : > { %v2635_v17 = vadd.f32 %v1323_v27, %v3840_v62  ;;  %v1325_v11 = vpop.f32.mrb[6].mxu0  ;;  %v3884_v53 = vsel %vm397_vm1, %v4450_v16, %v1377_v21  ;;  %v3890_v28 = vsel %vm478_vm9, %v4449_v22, %v1425_v46 }
 0x1ac   : > { %v3892_v43 = vmax.f32 %v2634_v25, 0.0  ;;  %v2636_v59 = vadd.f32 %v1325_v11, %v3836_v61  ;;  %v1327_v34 = vpop.f32.mrb[7].mxu0 }
 0x1ad   : > { %v3895_v36 = vmax.f32 %v2635_v17, 0.0  ;;  %v2637_v1 = vadd.f32 %v1327_v34, %v3840_v62 }
 0x1ae   : > { %v1378_v4 = vrot.slane %v3892_v43, 7  ;;  %v1426_v37 = vrot.slane %v3892_v43, 1  ;;  %v3900_v38 = vmax.f32 %v2636_v59, 0.0 }
 0x1af   : > { %v1379_v39 = vrot.slane %v3895_v36, 7  ;;  %v1427_v40 = vrot.slane %v3895_v36, 1  ;;  %v3904_v42 = vmax.f32 %v2637_v1, 0.0 }
 0x1b0   : > { %v3908_v44 = vsel %vm478_vm9, %v1424_v20, %v1426_v37  ;;  %v1380_v45 = vrot.slane %v3900_v38, 7  ;;  %v1428_v47 = vrot.slane %v3900_v38, 1  ;;  %v3914_v24 = vsel %vm397_vm1, %v1376_v51, %v1378_v4 }
 0x1b1   : > { %v1381_v52 = vrot.slane %v3904_v42, 7  ;;  %v1429_v56 = vrot.slane %v3904_v42, 1  ;;  %v1331_v58 = vpop.f32.mrb[8].mxu0  ;;  %v3922_v49 = vsel %vm397_vm1, %v1377_v21, %v1379_v39  ;;  %v3942_v21 = vsel %vm478_vm9, %v1425_v46, %v1427_v40 }
 0x1b2   : > { %v2638_v50 = vadd.f32 %v1331_v58, %v3836_v61  ;;  %v1333_v6 = vpop.f32.mrb[9].mxu0  ;;  %v3927_v0 = vsel %vm397_vm1, %v1378_v4, %v1380_v45  ;;  %v3960_v46 = vsel %vm478_vm9, %v1426_v37, %v1428_v47 }
 0x1b3   : > { %v2639_v3 = vadd.f32 %v1333_v6, %v3840_v62  ;;  %v1335_v54 = vpop.f32.mrb[10].mxu0  ;;  %v3936_v51 = vsel %vm397_vm1, %v1379_v39, %v1381_v52  ;;  %v3956_v1 = vsel %vm478_vm9, %v1427_v40, %v1429_v56 }
 0x1b4   : > { %v3944_v14 = vmax.f32 %v2638_v50, 0.0  ;;  %v2640_v25 = vadd.f32 %v1335_v54, %v3836_v61  ;;  %v1337_v27 = vpop.f32.mrb[11].mxu0 }
 0x1b5   : > { %v3951_v59 = vmax.f32 %v2639_v3, 0.0  ;;  %v2641_v34 = vadd.f32 %v1337_v27, %v3840_v62 }
 0x1b6   : > { %v1382_v4 = vrot.slane %v3944_v14, 7  ;;  %v1430_v39 = vrot.slane %v3944_v14, 1  ;;  %v3964_v58 = vmax.f32 %v2640_v25, 0.0 }
 0x1b7   : > { %v1383_v50 = vrot.slane %v3951_v59, 7  ;;  %v1431_v6 = vrot.slane %v3951_v59, 1  ;;  %v3968_v3 = vmax.f32 %v2641_v34, 0.0 }
 0x1b8   : > { %v1384_v54 = vrot.slane %v3964_v58, 7  ;;  %v1432_v40 = vrot.slane %v3964_v58, 1  ;;  %v3974_v37 = vsel %vm397_vm1, %v1380_v45, %v1382_v4  ;;  %v3997_v55 = vsel %vm478_vm9, %v1428_v47, %v1430_v39 }
 0x1b9   : > { %v1385_v25 = vrot.slane %v3968_v3, 7  ;;  %v1433_v60 = vrot.slane %v3968_v3, 1  ;;  %v1341_v57 = vpop.f32.mrb[12].mxu0  ;;  %v3982_v34 = vsel %vm397_vm1, %v1381_v52, %v1383_v50  ;;  %v3993_v27 = vsel %vm478_vm9, %v1429_v56, %v1431_v6 }
 0x1ba   : > { %v2642_v11 = vadd.f32 %v1341_v57, %v3836_v61  ;;  %v1343_v2 = vpop.f32.mrb[13].mxu0  ;;  %v3989_v45 = vsel %vm397_vm1, %v1382_v4, %v1384_v54 }
 0x1bb   : > { %v2643_v52 = vadd.f32 %v1343_v2, %v3840_v62  ;;  %v1345_v10 = vpop.f32.mrb[14].mxu0  ;;  %v1395_v48 = vsel %vm397_vm1, %v1383_v50, %v1385_v25  ;;  %v4017_v57 = vsel %vm478_vm9, %v1431_v6, %v1433_v60 }
 0x1bc   : > { %v4006_v26 = vmax.f32 %v2642_v11, 0.0  ;;  %v2644_v56 = vadd.f32 %v1345_v10, %v3836_v61  ;;  %v1347_v20 = vpop.f32.mrb[15].mxu0  ;;  %v1411_v47 = vpack.c.bf16 %v1395_v48, %v3982_v34  ;;  %v4021_v11 = vsel %vm478_vm9, %v1430_v39, %v1432_v40 }
 0x1bd   : > { %v4012_v17 = vmax.f32 %v2643_v52, 0.0  ;;  %v2645_v50 = vadd.f32 %v1347_v20, %v3840_v62 }
 0x1be   : > { %v1386_v61 = vrot.slane %v4006_v26, 7  ;;  %v1434_v10 = vrot.slane %v4006_v26, 1  ;;  %v4025_v48 = vmax.f32 %v2644_v56, 0.0 }
 0x1bf   : > { %v1387_v34 = vrot.slane %v4012_v17, 7  ;;  %v1435_v52 = vrot.slane %v4012_v17, 1  ;;  %v4029_v2 = vmax.f32 %v2645_v50, 0.0 }
 0x1c0   : > { %v1388_v62 = vrot.slane %v4025_v48, 7  ;;  %v1436_v20 = vrot.slane %v4025_v48, 1  ;;  %v1392_v39 = vsel %vm397_vm1, %v1384_v54, %v1386_v61  ;;  %v4055_v16 = vsel %vm478_vm9, %v1432_v40, %v1434_v10 }
 0x1c1   : > { %v1389_v4 = vrot.slane %v4029_v2, 7  ;;  %v1437_v56 = vrot.slane %v4029_v2, 1  ;;  %v1393_v41 = vsel %vm397_vm1, %v1385_v25, %v1387_v34  ;;  %v4051_v6 = vsel %vm478_vm9, %v1433_v60, %v1435_v52  ;;  %v2928_v60 = vld [vmem:[%s4442_s2 + $0x100] ss:$8 sps:$4 sm:$0xff]  }
 0x1c2   : > { %v1404_v22 = vsel %vm397_vm1, %v1388_v62, %v1374_v12  ;;  %v1390_v54 = vsel %vm397_vm1, %v1386_v61, %v1388_v62  ;;  %v4487_v25 = vrot.slane %v3847_v7, 7  ;;  %v1459_v40 = vpack.c.bf16 %v4051_v6, %v4017_v57  ;;  %v3025_v6 = vld [vmem:[%s3132_s22] sm:$0xff] }
 0x1c3   : > { %v1406_v18 = vpack.c.bf16 %v3877_v29, %v1404_v22  ;;  %v1391_v12 = vsel %vm397_vm1, %v1387_v34, %v1389_v4  ;;  %v1412_v31 = vpack.c.bf16 %v1390_v54, %v1392_v39  ;;  %v1458_v19 = vpack.c.bf16 %v4055_v16, %v4021_v11  ;;  %v2933_v22 = vld [vmem:[%s4442_s2 + $0x114] ss:$8 sps:$4 sm:$0xff]   ;;  %v2942_v54 = vld [vmem:[%s4442_s2 + $0x144] ss:$8 sps:$4 sm:$0xff]  }
 0x1c4   : > { %v1405_v50 = vsel %vm397_vm1, %v1389_v4, %v4487_v25  ;;  %v1413_v62 = vpack.c.bf16 %v1391_v12, %v1393_v41  ;;  %v4077_v29 = vsel %vm478_vm9, %v1435_v52, %v1437_v56  ;;  %v4087_v41 = vsel %vm478_vm9, %v1434_v10, %v1436_v20  ;;  %v2948_v25 = vld [vmem:[%s4442_s2 + $0x164] ss:$8 sps:$4 sm:$0xff]   ;;  %v2949_v12 = vld [vmem:[%s4442_s2 + $0x170] ss:$8 sps:$4 sm:$0xff]  }
 0x1c5   : > { %v1407_v61 = vpack.c.bf16 %v3884_v53, %v1405_v50  ;;  %v4488_v53 = vrot.slane %v3847_v7, 1  ;;  %v4489_v34 = vrot.slane %v3844_v15, 1  ;;  %v4490_v10 = vpack.c.bf16 %v3936_v51, %v3922_v49  ;;  %v2936_v50 = vld [vmem:[%s4442_s2 + $0x124] ss:$8 sps:$4 sm:$0xff]   ;;  %v2937_v51 = vld [vmem:[%s4442_s2 + $0x130] ss:$8 sps:$4 sm:$0xff]  }
 0x1c6   : > { %v4491_v49 = vpack.c.bf16 %v3927_v0, %v3914_v24  ;;  %v2940_v24 = vld [vmem:[%s4442_s2 + $0x140] ss:$8 sps:$4 sm:$0xff]   ;;  %v4492_v0 = vpack.c.bf16 %v3989_v45, %v3974_v37  ;;  %v4493_v45 = vpack.c.bf16 %v3854_v5, %v3847_v7  ;;  %v2955_v7 = vld [vmem:[%s4442_s2 + $0x190] ss:$8 sps:$4 sm:$0xff]   ;;  %v2960_v5 = vld [vmem:[%s4442_s2 + $0x1a4] ss:$8 sps:$4 sm:$0xff]  }
 0x1c7   : > { %v4083_v4 = vsel %vm478_vm9, %v1437_v56, %v4488_v53  ;;  %v4093_v39 = vsel %vm478_vm9, %v1436_v20, %v4489_v34  ;;  %2610 = vmatprep.mubr.msk.bf16.mxu1 %vm3182_vm5, %v1407_v61  ;;  %v2931_v20 = vld [vmem:[%s4442_s2 + $0x110] ss:$8 sps:$4 sm:$0xff]   ;;  %v2946_v37 = vld [vmem:[%s4442_s2 + $0x160] ss:$8 sps:$4 sm:$0xff]   ;;  %v2954_v61 = vld [vmem:[%s4442_s2 + $0x184] ss:$8 sps:$4 sm:$0xff]  }
 0x1c8   : > { %v1461_v52 = vpack.c.bf16 %v4083_v4, %v4077_v29  ;;  %v1460_v56 = vpack.c.bf16 %v4093_v39, %v4087_v41  ;;  %2611 = vmatmul.mubr.msk.bf16.vlgmr.msra.gmra.mrb[0].mxu1 %vm3182_vm5, %v1406_v18  ;;  %v2939_v18 = vld [vmem:[%s4442_s2 + $0x134] ss:$8 sps:$4 sm:$0xff]   ;;  %v2966_v53 = vld [vmem:[%s4442_s2 + $0x1c4] ss:$8 sps:$4 sm:$0xff]   ;;  %v2964_v34 = vld [vmem:[%s4442_s2 + $0x1c0] ss:$8 sps:$4 sm:$0xff]  }
 0x1c9   : > { %2132 = vmatpush1.bf16.msra.mxu1 %v2928_v60  ;;  %2612 = vmatprep.mubr.msk.bf16.mxu1 %vm3312_vm10, %v4490_v10  ;;  %v2958_v60 = vld [vmem:[%s4442_s2 + $0x1a0] ss:$8 sps:$4 sm:$0xff]   ;;  %v2969_v10 = vld [vmem:[%s4442_s2 + $0x1d4] ss:$8 sps:$4 sm:$0xff]   ;;  %v4507_v16 = vsub.s32 0, %v3114_v9 }
 0x1ca   : > { %2133 = vmatprep.subr.bf16.mxu1 %v2933_v22  ;;  %v2961_v22 = vld [vmem:[%s4442_s2 + $0x1b0] ss:$8 sps:$4 sm:$0xff]  }
 0x1cd   : > { %2134 = vmatpush1.bf16.msra.mxu1 %v2931_v20  ;;  %v2967_v20 = vld [vmem:[%s4442_s2 + $0x1d0] ss:$8 sps:$4 sm:$0xff]  }
 0x1ce   : > { %2135 = vmatprep.subr.bf16.mxu1 %v2936_v50  ;;  %v2972_v50 = vld [vmem:[%s4442_s2 + $0x1e4] ss:$8 sps:$4 sm:$0xff]  }
 0x1d0   : > { %2613 = vmatmul.mubr.msk.bf16.gmra.mrb[4].mxu1 %vm3312_vm10, %v4491_v49  ;;  %v2973_v49 = vld [vmem:[%s4442_s2 + $0x1f0] ss:$8 sps:$4 sm:$0xff]  }
 0x1d1   : > { %2136 = vmatpush1.bf16.msra.mxu1 %v2934_v33  ;;  %2614 = vmatprep.mubr.msk.bf16.mxu1 %vm3374_vm0, %v1411_v47  ;;  %v2943_v47 = vld [vmem:[%s4442_s2 + $0x150] ss:$8 sps:$4 sm:$0xff]   ;;  %v2970_v33 = vld [vmem:[%s4442_s2 + $0x1e0] ss:$8 sps:$4 sm:$0xff]  }
 0x1d2   : > { %2137 = vmatprep.subr.bf16.mxu1 %v2939_v18  ;;  %v2975_v18 = vld [vmem:[%s4442_s2 + $0x1f4] ss:$8 sps:$4 sm:$0xff]  }
 0x1d5   : > { %2138 = vmatpush1.bf16.msra.mxu1 %v2937_v51  ;;  %v2978_v51 = vld [vmem:[%s4442_s2 + $0x204] ss:$8 sps:$4 sm:$0xff]  }
 0x1d6   : > { %2139 = vmatprep.subr.bf16.mxu1 %v2942_v54  ;;  %v2976_v54 = vld [vmem:[%s4442_s2 + $0x200] ss:$8 sps:$4 sm:$0xff]  }
 0x1d8   : > { %2615 = vmatmul.mubr.msk.bf16.gmra.mrb[8].mxu1 %vm3374_vm0, %v4492_v0  ;;  %v4495_v0 = vpack.c.bf16 %v3904_v42, %v3895_v36  ;;  %v4496_v36 = vpack.c.bf16 %v3900_v38, %v3892_v43  ;;  %v4497_v42 = vpack.c.bf16 %v3968_v3, %v3951_v59  ;;  %v2988_v43 = vld [vmem:[%s4442_s2 + $0x240] ss:$8 sps:$4 sm:$0xff]   ;;  %v2993_v38 = vld [vmem:[%s4442_s2 + $0x254] ss:$8 sps:$4 sm:$0xff]   ;;  %v4498_v59 = vpack.c.bf16 %v3964_v58, %v3944_v14 }
 0x1d9   : > { %2140 = vmatpush1.bf16.msra.mxu1 %v2940_v24  ;;  %2616 = vmatprep.mubr.msk.bf16.mxu1 %vm3430_vm6, %v1413_v62  ;;  %v2963_v62 = vld [vmem:[%s4442_s2 + $0x1b4] ss:$8 sps:$4 sm:$0xff]   ;;  %v4499_v3 = vpack.c.bf16 %v4029_v2, %v4012_v17  ;;  %v2994_v14 = vld [vmem:[%s4442_s2 + $0x260] ss:$8 sps:$4 sm:$0xff]   ;;  %v4500_v58 = vpack.c.bf16 %v4025_v48, %v4006_v26  ;;  %v4501_v2 = vpack.c.bf16 %v3942_v21, %v3890_v28  ;;  %v3003_v21 = vld [vmem:[%s4442_s2 + $0x290] ss:$8 sps:$4 sm:$0xff]  }
 0x1da   : > { %2141 = vmatprep.subr.bf16.mxu1 %v2945_v30  ;;  %v2981_v24 = vld [vmem:[%s4442_s2 + $0x214] ss:$8 sps:$4 sm:$0xff]   ;;  %v4494_v30 = vpack.c.bf16 %v3850_v13, %v3844_v15  ;;  %v2982_v15 = vld [vmem:[%s4442_s2 + $0x220] ss:$8 sps:$4 sm:$0xff]   ;;  %v3008_v48 = vld [vmem:[%s4442_s2 + $0x2a4] ss:$8 sps:$4 sm:$0xff]  }
 0x1db   : > { %v2987_v13 = vld [vmem:[%s4442_s2 + $0x234] ss:$8 sps:$4 sm:$0xff]   ;;  %v3000_v26 = vld [vmem:[%s4442_s2 + $0x280] ss:$8 sps:$4 sm:$0xff]  }
 0x1dc   : > { %v2999_v17 = vld [vmem:[%s4442_s2 + $0x274] ss:$8 sps:$4 sm:$0xff]  }
 0x1dd   : > { %2142 = vmatpush1.bf16.msra.mxu1 %v2943_v47  ;;  %v2979_v47 = vld [vmem:[%s4442_s2 + $0x210] ss:$8 sps:$4 sm:$0xff]   ;;  %v3005_v28 = vld [vmem:[%s4442_s2 + $0x294] ss:$8 sps:$4 sm:$0xff]  }
 0x1de   : > { %2143 = vmatprep.subr.bf16.mxu1 %v2948_v25  ;;  %v2984_v25 = vld [vmem:[%s4442_s2 + $0x224] ss:$8 sps:$4 sm:$0xff]  }
 0x1e0   : > { %2617 = vmatmul.mubr.msk.bf16.gmra.mrb[12].mxu1 %vm3430_vm6, %v1412_v31  ;;  %v2957_v31 = vld [vmem:[%s4442_s2 + $0x194] ss:$8 sps:$4 sm:$0xff]  }
 0x1e1   : > { %2144 = vmatpush1.bf16.msra.mxu1 %v2946_v37  ;;  %2163 = vmatprep.mubr.bf16.mxu1 %v4493_v45  ;;  %v2985_v37 = vld [vmem:[%s4442_s2 + $0x230] ss:$8 sps:$4 sm:$0xff]  }
 0x1e2   : > { %2145 = vmatprep.subr.bf16.mxu1 %v2951_v63  ;;  %v2990_v63 = vld [vmem:[%s4442_s2 + $0x244] ss:$8 sps:$4 sm:$0xff]   ;;  %v2991_v45 = vld [vmem:[%s4442_s2 + $0x250] ss:$8 sps:$4 sm:$0xff]  }
 0x1e5   : > { %2146 = vmatpush1.bf16.msra.mxu1 %v2949_v12  ;;  %v2996_v12 = vld [vmem:[%s4442_s2 + $0x264] ss:$8 sps:$4 sm:$0xff]  }
 0x1e6   : > { %2147 = vmatprep.subr.bf16.mxu1 %v2954_v61  ;;  %v2997_v61 = vld [vmem:[%s4442_s2 + $0x270] ss:$8 sps:$4 sm:$0xff]  }
 0x1e9   : > { %2148 = vmatpush1.bf16.msra.mxu1 %v2952_v35  ;;  %v3002_v35 = vld [vmem:[%s4442_s2 + $0x284] ss:$8 sps:$4 sm:$0xff]  }
 0x1ea   : > { %2149 = vmatprep.subr.bf16.mxu1 %v2957_v31  ;;  %v3006_v31 = vld [vmem:[%s4442_s2 + $0x2a0] ss:$8 sps:$4 sm:$0xff]  }
 0x1ed   : > { %2150 = vmatpush1.bf16.msra.mxu1 %v2955_v7  ;;  %v3011_v7 = vld [vmem:[%s4442_s2 + $0x2b4] ss:$8 sps:$4 sm:$0xff]  }
 0x1ee   : > { %2151 = vmatprep.subr.bf16.mxu1 %v2960_v5  ;;  %v3009_v5 = vld [vmem:[%s4442_s2 + $0x2b0] ss:$8 sps:$4 sm:$0xff]  }
 0x1f1   : > { %2152 = vmatpush1.bf16.msra.mxu1 %v2958_v60  ;;  %v3014_v60 = vld [vmem:[%s4442_s2 + $0x2c4] ss:$8 sps:$4 sm:$0xff]  }
 0x1f2   : > { %2153 = vmatprep.subr.bf16.mxu1 %v2963_v62  ;;  %v3012_v62 = vld [vmem:[%s4442_s2 + $0x2c0] ss:$8 sps:$4 sm:$0xff]  }
 0x1f5   : > { %2154 = vmatpush1.bf16.msra.mxu1 %v2961_v22  ;;  %v3017_v22 = vld [vmem:[%s4442_s2 + $0x2d4] ss:$8 sps:$4 sm:$0xff]  }
 0x1f6   : > { %2155 = vmatprep.subr.bf16.mxu1 %v2966_v53  ;;  %v3015_v53 = vld [vmem:[%s4442_s2 + $0x2d0] ss:$8 sps:$4 sm:$0xff]  }
 0x1f9   : > { %2156 = vmatpush1.bf16.msra.mxu1 %v2964_v34  ;;  %v3020_v34 = vld [vmem:[%s4442_s2 + $0x2e4] ss:$8 sps:$4 sm:$0xff]  }
 0x1fa   : > { %2157 = vmatprep.subr.bf16.mxu1 %v2969_v10  ;;  %v3018_v10 = vld [vmem:[%s4442_s2 + $0x2e0] ss:$8 sps:$4 sm:$0xff]  }
 0x1fd   : > { %2158 = vmatpush1.bf16.msra.mxu1 %v2967_v20  ;;  %v3023_v20 = vld [vmem:[%s4442_s2 + $0x2f4] ss:$8 sps:$4 sm:$0xff]  }
 0x1fe   : > { %2159 = vmatprep.subr.bf16.mxu1 %v2972_v50  ;;  %v3021_v50 = vld [vmem:[%s4442_s2 + $0x2f0] ss:$8 sps:$4 sm:$0xff]  }
 0x201   : > { %2160 = vmatpush1.bf16.msra.mxu1 %v2970_v33  ;;  %v4502_v33 = vpack.c.bf16 %v3908_v44, %v3870_v23  ;;  %v4508_v44 = vsub.s32 1, %v3114_v9  ;;  %v3026_v9 = vld [vmem:[%s3132_s22 + $0x8] sm:$0xff] }
 0x202   : > { %2161 = vmatprep.subr.bf16.mxu1 %v2975_v18  ;;  %v4503_v18 = vpack.c.bf16 %v3993_v27, %v3956_v1 }
 0x205   : > { %2162 = vmatpush1.bf16.msra.mxu1 %v2973_v49  ;;  %v4504_v49 = vpack.c.bf16 %v3997_v55, %v3960_v46  ;;  %v4380_v55 = vrot.slane %v1566_v8, %v4508_v44 }
 0x206   : > { %2204 = vmatprep.subr.bf16.mxu1 %v2978_v51 }
 0x208   : > { %2164 = vmatmul.mubr.bf16.vlgmr.msra.gmra.mrb[0].mxu1 %v4494_v30 }
 0x209   : > { %2173 = vmatprep.mubr.bf16.mxu1 %v4495_v0  ;;  %2205 = vmatpush1.bf16.msra.mxu1 %v2976_v54 }
 0x20a   : > { %2206 = vmatprep.subr.bf16.mxu1 %v2981_v24  ;;  %v3028_v24 = vld [vmem:[%s3132_s22 + $0x18] sm:$0xff] }
 0x20d   : > { %2207 = vmatpush1.bf16.msra.mxu1 %v2979_v47 }
 0x20e   : > { %2208 = vmatprep.subr.bf16.mxu1 %v2984_v25 }
 0x210   : > { %2174 = vmatmul.mubr.bf16.gmra.mrb[4].mxu1 %v4496_v36 }
 0x211   : > { %2183 = vmatprep.mubr.bf16.mxu1 %v4497_v42  ;;  %2209 = vmatpush1.bf16.msra.mxu1 %v2982_v15 }
 0x212   : > { %2210 = vmatprep.subr.bf16.mxu1 %v2987_v13 }
 0x215   : > { %2211 = vmatpush1.bf16.msra.mxu1 %v2985_v37  ;;  %v3029_v37 = vld [vmem:[%s3132_s22 + $0x20] sm:$0xff] }
 0x216   : > { %2212 = vmatprep.subr.bf16.mxu1 %v2990_v63 }
 0x218   : > { %2184 = vmatmul.mubr.bf16.gmra.mrb[8].mxu1 %v4498_v59  ;;  %v3030_v59 = vld [vmem:[%s3132_s22 + $0x28] sm:$0xff] }
 0x219   : > { %2193 = vmatprep.mubr.bf16.mxu1 %v4499_v3  ;;  %2213 = vmatpush1.bf16.msra.mxu1 %v2988_v43 }
 0x21a   : > { %2214 = vmatprep.subr.bf16.mxu1 %v2993_v38 }
 0x21d   : > { %2215 = vmatpush1.bf16.msra.mxu1 %v2991_v45 }
 0x21e   : > { %2216 = vmatprep.subr.bf16.mxu1 %v2996_v12 }
 0x220   : > { %2194 = vmatmul.mubr.bf16.gmra.mrb[12].mxu1 %v4500_v58 }
 0x221   : > { %2217 = vmatpush1.bf16.msra.mxu1 %v2994_v14  ;;  %2618 = vmatprep.mubr.msk.bf16.mxu1 %vm3632_vm11, %v4501_v2  ;;  %v3031_v14 = vld [vmem:[%s3132_s22 + $0x30] sm:$0xff]  ;;  %v3032_v2 = vld [vmem:[%s3132_s22 + $0x38] sm:$0xff] }
 0x222   : > { %2218 = vmatprep.subr.bf16.mxu1 %v2999_v17 }
 0x225   : > { %2219 = vmatpush1.bf16.msra.mxu1 %v2997_v61 }
 0x226   : > { %2220 = vmatprep.subr.bf16.mxu1 %v3002_v35 }
 0x229   : > { %2221 = vmatpush1.bf16.msra.mxu1 %v3000_v26 }
 0x22a   : > { %2222 = vmatprep.subr.bf16.mxu1 %v3005_v28 }
 0x22d   : > { %2223 = vmatpush1.bf16.msra.mxu1 %v3003_v21 }
 0x22e   : > { %2224 = vmatprep.subr.bf16.mxu1 %v3008_v48 }
 0x231   : > { %2225 = vmatpush1.bf16.msra.mxu1 %v3006_v31 }
 0x232   : > { %2226 = vmatprep.subr.bf16.mxu1 %v3011_v7 }
 0x235   : > { %2227 = vmatpush1.bf16.msra.mxu1 %v3009_v5  ;;  %v3033_v5 = vld [vmem:[%s3132_s22 + $0x40] sm:$0xff] }
 0x236   : > { %2228 = vmatprep.subr.bf16.mxu1 %v3014_v60 }
 0x239   : > { %2229 = vmatpush1.bf16.msra.mxu1 %v3012_v62 }
 0x23a   : > { %2230 = vmatprep.subr.bf16.mxu1 %v3017_v22 }
 0x23d   : > { %2231 = vmatpush1.bf16.msra.mxu1 %v3015_v53  ;;  %v3034_v53 = vld [vmem:[%s3132_s22 + $0x48] sm:$0xff] }
 0x23e   : > { %2232 = vmatprep.subr.bf16.mxu1 %v3020_v34 }
 0x241   : > { %2233 = vmatpush1.bf16.msra.mxu1 %v3018_v10 }
 0x242   : > { %2234 = vmatprep.subr.bf16.mxu1 %v3023_v20 }
 0x245   : > { %2235 = vmatpush1.bf16.msra.mxu1 %v3021_v50  ;;  %v3035_v50 = vld [vmem:[%s3132_s22 + $0x50] sm:$0xff] }
 0x248   : > { %2619 = vmatmul.mubr.msk.bf16.vlgmr.msra.gmra.mrb[0].mxu1 %vm3632_vm11, %v4502_v33 }
 0x249   : > { %2620 = vmatprep.mubr.msk.bf16.mxu1 %vm3709_vm12, %v4503_v18 }
 0x250   : > { %2621 = vmatmul.mubr.msk.bf16.gmra.mrb[4].mxu1 %vm3709_vm12, %v4504_v49  ;;  %v3036_v49 = vld [vmem:[%s3132_s22 + $0x58] sm:$0xff] }
 0x251   : > { %2622 = vmatprep.mubr.msk.bf16.mxu1 %vm3732_vm13, %v1459_v40 }
 0x258   : > { %2623 = vmatmul.mubr.msk.bf16.gmra.mrb[8].mxu1 %vm3732_vm13, %v1458_v19  ;;  %v4376_v19 = vrot.slane %v1566_v8, %v4507_v16 }
 0x259   : > { %2624 = vmatprep.mubr.msk.bf16.mxu1 %vm3758_vm14, %v1461_v52 }
 0x260   : > { %2625 = vmatmul.mubr.msk.bf16.gmra.mrb[12].mxu1 %vm3758_vm14, %v1460_v56  ;;  %v3027_v56 = vld [vmem:[%s3132_s22 + $0x10] sm:$0xff] }
 0x31b   : > { %v2238_v1 = vpop.f32.mrb[0].mxu1 }
 0x31c   : > { %v2646_v46 = vadd.f32 %v2238_v1, %v4376_v19  ;;  %v2240_v27 = vpop.f32.mrb[1].mxu1 }
 0x31d   : > { %v2647_v57 = vadd.f32 %v2240_v27, %v4380_v55  ;;  %v2242_v11 = vpop.f32.mrb[2].mxu1 }
 0x31e   : > { %v2277_v40 = vadd.f32 %v3025_v6, %v2646_v46  ;;  %v2648_v29 = vadd.f32 %v2242_v11, %v4376_v19  ;;  %v2244_v4 = vpop.f32.mrb[3].mxu1 }
 0x31f   : > { %v2278_v41 = vadd.f32 %v3026_v9, %v2647_v57  ;;  %v2649_v39 = vadd.f32 %v2244_v4, %v4380_v55  ;;  %v3037_v57 = vld [vmem:[%s3132_s22 + $0x60] sm:$0xff] }
 0x320   : > { %v2293_v52 = vmax.f32 %v2277_v40, 0.0  ;;  %v2279_v51 = vadd.f32 %v3027_v56, %v2648_v29  ;;  %v3038_v29 = vld [vmem:[%s3132_s22 + $0x68] sm:$0xff] }
 0x321   : > { %v2294_v54 = vmax.f32 %v2278_v41, 0.0  ;;  %v2280_v30 = vadd.f32 %v3028_v24, %v2649_v39  ;;  %v3039_v39 = vld [vmem:[%s3132_s22 + $0x70] sm:$0xff] }
 0x322   : > { %2309 = vst [vmem:[%s4391_s10] sm:$0xff] %v2293_v52  ;;  %v2295_v0 = vmax.f32 %v2279_v51, 0.0  ;;  %v4509_v51 = vld [vmem:[#allocation3_spill] sm:$0xff] }
 0x323   : > { %2310 = vst [vmem:[%s4391_s10 + $0x8] sm:$0xff] %v2294_v54  ;;  %v2296_v47 = vmax.f32 %v2280_v30, 0.0  ;;  %v2248_v25 = vpop.f32.mrb[4].mxu1 }
 0x324   : > { %2311 = vst [vmem:[%s4391_s10 + $0x10] sm:$0xff] %v2295_v0  ;;  %v2650_v15 = vadd.f32 %v2248_v25, %v4376_v19  ;;  %v2250_v13 = vpop.f32.mrb[5].mxu1 }
 0x325   : > { %2312 = vst [vmem:[%s4391_s10 + $0x18] sm:$0xff] %v2296_v47  ;;  %v2651_v36 = vadd.f32 %v2250_v13, %v4380_v55  ;;  %v2252_v42 = vpop.f32.mrb[6].mxu1 }
 0x326   : > { %v2281_v63 = vadd.f32 %v3029_v37, %v2650_v15  ;;  %v2652_v43 = vadd.f32 %v2252_v42, %v4376_v19  ;;  %v2254_v38 = vpop.f32.mrb[7].mxu1 }
 0x327   : > { %v2282_v3 = vadd.f32 %v3030_v59, %v2651_v36  ;;  %v2653_v45 = vadd.f32 %v2254_v38, %v4380_v55 }
 0x328   : > { %v2297_v12 = vmax.f32 %v2281_v63, 0.0  ;;  %v2283_v17 = vadd.f32 %v3031_v14, %v2652_v43 }
 0x329   : > { %v2298_v58 = vmax.f32 %v2282_v3, 0.0  ;;  %v2284_v61 = vadd.f32 %v3032_v2, %v2653_v45 }
 0x32a   : > { %2313 = vst [vmem:[%s4391_s10 + $0x20] sm:$0xff] %v2297_v12  ;;  %v2299_v35 = vmax.f32 %v2283_v17, 0.0 }
 0x32b   : > { %2314 = vst [vmem:[%s4391_s10 + $0x28] sm:$0xff] %v2298_v58  ;;  %v2300_v26 = vmax.f32 %v2284_v61, 0.0  ;;  %v2258_v28 = vpop.f32.mrb[8].mxu1 }
 0x32c   : > { %2315 = vst [vmem:[%s4391_s10 + $0x30] sm:$0xff] %v2299_v35  ;;  %v2654_v21 = vadd.f32 %v2258_v28, %v4376_v19  ;;  %v2260_v48 = vpop.f32.mrb[9].mxu1 }
 0x32d   : > { %2316 = vst [vmem:[%s4391_s10 + $0x38] sm:$0xff] %v2300_v26  ;;  %v2655_v31 = vadd.f32 %v2260_v48, %v4380_v55  ;;  %v2262_v7 = vpop.f32.mrb[10].mxu1 }
 0x32e   : > { %v2285_v60 = vadd.f32 %v3033_v5, %v2654_v21  ;;  %v2656_v62 = vadd.f32 %v2262_v7, %v4376_v19  ;;  %v2264_v22 = vpop.f32.mrb[11].mxu1 }
 0x32f   : > { %v2286_v34 = vadd.f32 %v3034_v53, %v2655_v31  ;;  %v2657_v10 = vadd.f32 %v2264_v22, %v4380_v55 }
 0x330   : > { %v2301_v20 = vmax.f32 %v2285_v60, 0.0  ;;  %v2287_v33 = vadd.f32 %v3035_v50, %v2656_v62 }
 0x331   : > { %v2302_v18 = vmax.f32 %v2286_v34, 0.0  ;;  %v2288_v23 = vadd.f32 %v3036_v49, %v2657_v10 }
 0x332   : > { %2317 = vst [vmem:[%s4391_s10 + $0x40] sm:$0xff] %v2301_v20  ;;  %v2303_v32 = vmax.f32 %v2287_v33, 0.0 }
 0x333   : > { %2318 = vst [vmem:[%s4391_s10 + $0x48] sm:$0xff] %v2302_v18  ;;  %v2304_v8 = vmax.f32 %v2288_v23, 0.0  ;;  %v2268_v16 = vpop.f32.mrb[12].mxu1 }
 0x334   : > { %2319 = vst [vmem:[%s4391_s10 + $0x50] sm:$0xff] %v2303_v32  ;;  %v2658_v44 = vadd.f32 %v2268_v16, %v4376_v19  ;;  %v2270_v1 = vpop.f32.mrb[13].mxu1 }
 0x335   : > { %2320 = vst [vmem:[%s4391_s10 + $0x58] sm:$0xff] %v2304_v8  ;;  %v2659_v46 = vadd.f32 %v2270_v1, %v4380_v55  ;;  %v2272_v27 = vpop.f32.mrb[14].mxu1 }
 0x336   : > { %v2289_v11 = vadd.f32 %v3037_v57, %v2658_v44  ;;  %v2660_v6 = vadd.f32 %v2272_v27, %v4376_v19  ;;  %v2274_v40 = vpop.f32.mrb[15].mxu1 }
 0x337   : > { %v2290_v4 = vadd.f32 %v3038_v29, %v2659_v46  ;;  %v2661_v9 = vadd.f32 %v2274_v40, %v4380_v55 }
 0x338   : > { %v2305_v41 = vmax.f32 %v2289_v11, 0.0  ;;  %v2291_v52 = vadd.f32 %v3039_v39, %v2660_v6 }
 0x339   : > { %v2306_v56 = vmax.f32 %v2290_v4, 0.0  ;;  %v2292_v54 = vadd.f32 %v4509_v51, %v2661_v9 }
 0x33a   : > { %2321 = vst [vmem:[%s4391_s10 + $0x60] sm:$0xff] %v2305_v41  ;;  %v2307_v24 = vmax.f32 %v2291_v52, 0.0 }
 0x33b   : > { %2322 = vst [vmem:[%s4391_s10 + $0x68] sm:$0xff] %v2306_v56  ;;  %v2308_v30 = vmax.f32 %v2292_v54, 0.0 }
 0x33c   : > { %2323 = vst [vmem:[%s4391_s10 + $0x70] sm:$0xff] %v2307_v24 }
 0x33d   : > { %2324 = vst [vmem:[%s4391_s10 + $0x78] sm:$0xff] %v2308_v30 }
 0x33e PF: > { %s15_s18 = sadd.s32 1, %s3046_s18  }
 0x33f   : > { %p12_p4 = scmp.ge.s32.totalorder %s15_s18, 4  }
 0x341   :  { %14 = sbr.rel (!%p12_p4) target bundleno = 1 (0x1), region = 70 }

</bundles_post_ra>
